<compile_context>
chip_gen: v7x
topology: tpu7x:2x2x1
jax: 0.10.0
libtpu: 0.0.40
codegen_flags: <defaults>
</compile_context>

<pallas_src>
import jax
import jax.numpy as jnp
from jax.experimental import pallas as pl
from jax.experimental.pallas import tpu as pltpu

LANES = 1024                      # lane-dense slab width (multiple of 128)
SMALL_FALLBACK_ELEMS = 64 * 1024  # below this, plain-JAX fused elementwise wins


def _round_up(x: int, m: int) -> int:
    return (x + m - 1) // m * m


def _block_bytes_and_vmem_limit():
    """Pick a per-generation block size (bytes) and optional scoped-VMEM bump."""
    try:
        kind = jax.devices()[0].device_kind.lower()
    except Exception:  # pragma: no cover - defensive
        kind = ""
    if "v5" in kind:                 # v5e/v5p: 16 MiB scoped-VMEM default
        return 2 << 20, None         # 2 MiB block -> 8 MiB double-buffered
    if "v6" in kind:                 # v6e: 32 MiB scoped default, 1.4 TB/s HBM
        return 4 << 20, None         # 4 MiB block -> 16 MiB double-buffered
    if "v7" in kind or "tpu7" in kind or "7x" in kind:
        # v7x: 3.2 TB/s HBM -> bigger blocks; raise scoped VMEM above default.
        return 8 << 20, 48 << 20
    return 2 << 20, None             # unknown / older (v4 etc.): conservative


def _silu_kernel(x_ref, o_ref):
    x32 = x_ref[...].astype(jnp.float32)
    # sigmoid(x) = 0.5 * (tanh(x/2) + 1): single EUP op, no exp overflow.
    o_ref[...] = (x32 * (0.5 * jnp.tanh(0.5 * x32) + 0.5)).astype(o_ref.dtype)


def _silu_jax(x):
    x32 = x.astype(jnp.float32)
    return (x32 * (0.5 * jnp.tanh(0.5 * x32) + 0.5)).astype(x.dtype)


def silu_pallas(x: jax.Array) -> jax.Array:
    """Applies SiLU elementwise via a Pallas TPU kernel. Matches F.silu(x)."""
    orig_shape = x.shape
    dtype = x.dtype
    n = int(x.size)

    # Zero-size tensors (the "zero_size" case): nothing to compute.
    if n == 0:
        return jnp.empty(orig_shape, dtype=dtype)

    # Tiny activations: the pallas_call launch dominates; let XLA fuse it.
    if n < SMALL_FALLBACK_ELEMS:
        return _silu_jax(x)

    block_bytes, vmem_limit = _block_bytes_and_vmem_limit()
    itemsize = x.dtype.itemsize

    cp_kwargs = dict(dimension_semantics=("parallel",))
    if vmem_limit is not None:
        cp_kwargs["vmem_limit_bytes"] = vmem_limit
    compiler_params = pltpu.CompilerParams(**cp_kwargs)

    flat = x.reshape(-1)  # contiguous reshape: free, no HBM pass

    if n % LANES == 0:
        # Lane-dense 2-D slab: every store is a long unmasked vst burst.
        rows = n // LANES
        row_align = max(8, 32 // itemsize)       # (8,128) f32 / (16,128) bf16 min tile
        tile_rows = min(block_bytes // (LANES * itemsize), rows)
        if tile_rows == rows and rows >= 2 * row_align:
            # Keep >= 2 grid steps so the parallel axis feeds both v7x TCs.
            tile_rows = _round_up(pl.cdiv(rows, 2), row_align)
        slab = flat.reshape(rows, LANES)
        grid = (pl.cdiv(rows, tile_rows),)
        out = pl.pallas_call(
            _silu_kernel,
            out_shape=jax.ShapeDtypeStruct(slab.shape, dtype),
            grid=grid,
            in_specs=[pl.BlockSpec((tile_rows, LANES), lambda i: (i, 0))],
            out_specs=pl.BlockSpec((tile_rows, LANES), lambda i: (i, 0)),
            compiler_params=compiler_params,
        )(slab)
        out_flat = out.reshape(-1)
    else:
        # Ragged size: 1-D blocks; Pallas masks the partial final block
        # in-kernel (masked vst only on the last step), so there is no pad
        # before nor slice after the call -> no extra HBM passes.
        elem_align = 8 * 128
        tile_elems = min(block_bytes // itemsize, n)
        if tile_elems == n and n >= 2 * elem_align:
            tile_elems = _round_up(pl.cdiv(n, 2), elem_align)
        grid = (pl.cdiv(n, tile_elems),)
        out_flat = pl.pallas_call(
            _silu_kernel,
            out_shape=jax.ShapeDtypeStruct((n,), dtype),
            grid=grid,
            in_specs=[pl.BlockSpec((tile_elems,), lambda i: (i,))],
            out_specs=pl.BlockSpec((tile_elems,), lambda i: (i,)),
            compiler_params=compiler_params,
        )(flat)

    return out_flat.reshape(orig_shape)


if __name__ == "__main__":
    key = jax.random.PRNGKey(0)
    k0, k1, k2 = jax.random.split(key, 3)

    def ref_silu(x):
        x32 = x.astype(jnp.float32)
        return (x32 * jax.nn.sigmoid(x32)).astype(x.dtype)

    # Spec-sized input (2, 4, 16, 16): tiny -> plain-JAX fast path.
    x_small = jax.random.normal(k0, (2, 4, 16, 16), dtype=jnp.float32)
    y_small = silu_pallas(x_small)
    jax.block_until_ready(y_small)
    assert y_small.shape == x_small.shape and y_small.dtype == x_small.dtype
    assert jnp.allclose(y_small, ref_silu(x_small), atol=1e-5, rtol=1e-5)

    # Lane-aligned f32 input large enough to exercise the 2-D Pallas path.
    x_main = jax.random.normal(k1, (8, 8, 64, 64), dtype=jnp.float32)  # 262144 elems
    y_main = silu_pallas(x_main)
    jax.block_until_ready(y_main)
    assert jnp.allclose(y_main, ref_silu(x_main), atol=1e-5, rtol=1e-5)

    # Ragged (non-128-multiple) size -> 1-D masked-tail Pallas path (no pad/slice).
    x_rag = jax.random.normal(k2, (5, 97, 193), dtype=jnp.float32)     # 93605 elems
    y_rag = silu_pallas(x_rag)
    jax.block_until_ready(y_rag)
    assert jnp.allclose(y_rag, ref_silu(x_rag), atol=1e-5, rtol=1e-5)

    # bf16: computed in f32 inside the kernel, cast back on store; rows/block
    # double so the block stays constant in bytes.
    x_bf = x_main.astype(jnp.bfloat16)
    y_bf = silu_pallas(x_bf)
    jax.block_until_ready(y_bf)
    assert y_bf.dtype == jnp.bfloat16
    assert jnp.allclose(y_bf.astype(jnp.float32),
                        ref_silu(x_bf).astype(jnp.float32), atol=1e-2, rtol=1e-2)

    # Zero-size tensor (the case the PyTorch test targets).
    x_zero = jnp.zeros((0, 4, 16, 16), dtype=jnp.float32)
    y_zero = silu_pallas(x_zero)
    jax.block_until_ready(y_zero)
    assert y_zero.shape == x_zero.shape and y_zero.dtype == x_zero.dtype

    print("KERNEL_OK")
</pallas_src>

<mosaic_0001>
module attributes {stable_mosaic.version = 11 : i64} {
  func.func @_silu_kernel(%arg0: i32, %arg1: memref<128x1024xf32, #tpu.memory_space<vmem>>, %arg2: memref<128x1024xf32, #tpu.memory_space<vmem>>) attributes {dimension_semantics = [#tpu.dimension_semantics<parallel>], iteration_bounds = array<i64: 2>, scalar_prefetch = 0 : i64, scratch_operands = 0 : i64, tpu.core_type = #tpu.core_type<tc>, window_params = [{transform_indices = @transform_0, window_bounds = array<i64: 128, 1024>}, {transform_indices = @transform_1, window_bounds = array<i64: 128, 1024>}]} {
    %c0 = arith.constant 0 : index
    %c0_0 = arith.constant 0 : index
    %0 = vector.load %arg1[%c0, %c0_0] : memref<128x1024xf32, #tpu.memory_space<vmem>>, vector<128x1024xf32>
    %cst = arith.constant 5.000000e-01 : f32
    %1 = vector.broadcast %cst : f32 to vector<128x1024xf32>
    %2 = arith.mulf %1, %0 : vector<128x1024xf32>
    %3 = math.tanh %2 : vector<128x1024xf32>
    %cst_1 = arith.constant 5.000000e-01 : f32
    %4 = vector.broadcast %cst_1 : f32 to vector<128x1024xf32>
    %5 = arith.mulf %4, %3 : vector<128x1024xf32>
    %cst_2 = arith.constant 5.000000e-01 : f32
    %6 = vector.broadcast %cst_2 : f32 to vector<128x1024xf32>
    %7 = arith.addf %5, %6 : vector<128x1024xf32>
    %8 = arith.mulf %0, %7 : vector<128x1024xf32>
    %c0_3 = arith.constant 0 : index
    %c0_4 = arith.constant 0 : index
    %9 = vector.load %arg2[%c0_3, %c0_4] : memref<128x1024xf32, #tpu.memory_space<vmem>>, vector<128x1024xf32>
    tpu.vector_store %arg2[%c0_3, %c0_4], %8 {strides = array<i32>} : memref<128x1024xf32, #tpu.memory_space<vmem>>, vector<128x1024xf32>,
    return
  }
  func.func @transform_0(%arg0: i32) -> (i32, i32) {
    %c0_i32 = arith.constant 0 : i32
    %c0_i32_0 = arith.constant 0 : i32
    return %arg0, %c0_i32 : i32, i32
  }
  func.func @transform_1(%arg0: i32) -> (i32, i32) {
    %c0_i32 = arith.constant 0 : i32
    %c0_i32_0 = arith.constant 0 : i32
    return %arg0, %c0_i32 : i32, i32
  }
}

</mosaic_0001>

<bundles_post_ra>
// kernel: tpu_custom_call.1
= control target key start
LH: loop header
LB: loop body
LE: loop exit
PB: predicated region body
PF: predicated region fallthrough
CT: control target
= control target key end

     0   :  { %6 = vsyncpa [#allocation3], 0  ;;  %s2603_s0 = inlined_call_operand.hbm [shape: f32[256,1024], index: 0, kind: input, shape index: {}]   ;;  %s2604_s1 = inlined_call_operand.hbm [shape: f32[256,1024], index: 1, kind: output, shape index: {}]  }
   0x1   :  { %8 = vsyncpa [#allocation3 + $0x1], 0 }
   0x2   :  { %9 = vsyncpa [#allocation4], 0 }
   0x3   :  { %11 = vsyncpa [#allocation4 + $0x1], 0  ;;  %s1562_s6 = smov 0   ;;  %s1564_s7 = smov 0  }
   0x4   :  { %s1566_s8 = smov 0   ;;  %s1568_s9 = smov 0  }
   0x5 LB: > { %s1583_s10 = sadd.s32 4294967295, %s1544_s9   ;;  %s1122_s11 = sadd.s32 4294967294, %s1544_s9   ;;  %s1544_s9 = sphi %s1568_s9, %s2692_s9   ;;  %s1540_s8 = sphi %s1566_s8, %s2691_s8   ;;  %s1536_s7 = sphi %s1564_s7, %s2690_s7   ;;  %s1532_s6 = sphi %s1562_s6, %s2689_s6  }
   0x6   : > { %s1587_s12 = sadd.s32 1, %s1544_s9   ;;  %s24_s13 = sadd.s32 1, %s1540_s8 }
   0x7   : > { %s21_s14 = ssub.s32 %s1544_s9, %s1587_s12  ;;  %p31_p0 = scmp.ne.s32.totalorder %s1540_s8, %s1536_s7 }
   0x8   : > { %p22_p1 = scmp.eq.s32.totalorder %s21_s14, 0  ;;  %p32_p2 = scmp.eq.s32.totalorder %s1544_s9, 0 }
   0x9   : > { %p37_p3 = scmp.ne.s32.totalorder %s1536_s7, %s1532_s6  ;;  %p38_p4 = scmp.eq.s32.totalorder %s1583_s10, 0 }
   0xa   : > { %s1599_s15 = scalar_select %p22_p1, %s1540_s8, %s24_s13  }
   0xb   : > { %p1601_p5 = por %p32_p2, %p31_p0  ;;  %p1605_p6 = por %p38_p4, %p37_p3 }
   0xc   : > { %p61_p7 = scmp.eq.s32.totalorder %s1583_s10, 1  ;;  %p67_p8 = scmp.eq.s32.totalorder %s1122_s11, 1 }
   0xd   : > { %p1154_p10 = scmp.lt.s32.totalorder %s1544_s9, 2  ;;  %s87_s20 = sand.u32 1, %s1540_s8  }
   0xe   : > { %p1612_p11 = por %p61_p7, %p31_p0  ;;  %p1616_p12 = por %p67_p8, %p37_p3 }
   0xf   : > { %s1139_s21 = sshll.u32 %s1544_s9, 14  ;;  %s1125_s22 = sshll.u32 %s87_s20, 10 }
  0x10   : > { %s2629_s18 = scalar_select %p1612_p11, 1, 0 }
  0x11   : > { %s2630_s19 = scalar_select %p1616_p12, 1, 0 }
  0x12   : > { %s1625_s25 = scalar_lea.hbm %s2603_s0, %s1139_s21  ;;  %s91_s26 = scalar_lea.vmem [#allocation2], %s1125_s22 }
  0x13   : > { %s99_s27 = sshll.u32 %s91_s26, 4  ;;  %p1629_p13 = pnand %p1154_p10, %p1601_p5  ;;  %s1633_s27 = int_to_ptr.vmem [resolvable:$true] %s99_s27 }
  0x14   : > { %s1635_s29 = scalar_lea.sflag [#allocation3], %s87_s20  ;;  %s1448_s30 = scalar_lea.hbm %s1625_s25, 16384 }
  0x15   : > { %p1449_p0 = scmp.ne.s32.totalorder %s1625_s25, %s1448_s30  ;;  %p1450_p1 = pneg %p1629_p13 }
  0x16   : > { %s1453_s4 = scalar_lea.hbm %s2603_s0, 32768  ;;  %p1454_p4 = scmp.lt.u32.totalorder %s1625_s25, %s2603_s0 }
  0x17   : > { %p1451_p2 = pnand %p1450_p1, %p1449_p0  ;;  %p1455_p5 = scmp.lt.u32.totalorder %s1453_s4, %s1448_s30 }
  0x18   : > { %p1457_p8 = scmp.lt.u32.totalorder %s1448_s30, %s1625_s25 }
  0x19   : > { %p1452_p3 = pneg %p1451_p2  ;;  %p1456_p7 = por %p1455_p5, %p1454_p4 }
  0x1b   : > { %p1458_p10 = por %p1457_p8, %p1456_p7 }
  0x1d   : > { %p1459_p9 = pnand %p1458_p10, %p1452_p3 }
  0x1f   : > { %1462 = shalt.err (!%p1459_p9)
}
  0x20   : > { %s1463_s13 = scalar_lea.vmem %s1633_s27, 16384  ;;  %s1546_s14 = smov [#allocation2]  }
  0x21   : > { %p1464_p0 = scmp.ne.s32.totalorder %s1633_s27, %s1463_s13  ;;  %s1468_s16 = sshll.u32 %s1546_s14, 4  ;;  %s1469_s16 = int_to_ptr.vmem [resolvable:$false] %s1468_s16 }
  0x22   : > { %s1470_s20 = scalar_lea.vmem %s1469_s16, 32768  ;;  %p1471_p11 = scmp.lt.s32.totalorder %s1633_s27, %s1469_s16 }
  0x23   : > { %p1466_p2 = pnand %p1464_p0, %p1450_p1  ;;  %p1472_p4 = scmp.lt.s32.totalorder %s1470_s20, %s1463_s13 }
  0x25   : > { %p1467_p12 = pneg %p1466_p2  ;;  %p1473_p5 = por %p1472_p4, %p1471_p11 }
  0x27   : > { %p1474_p7 = pnand %p1473_p5, %p1467_p12 }
  0x29   : > { %1477 = shalt.err (!%p1474_p7)
}
  0x2a   : > { %s1547_s21 = smov 1024   ;;  %s1548_s22 = smov 64  }
  0x2b   : > { %1149 = dma.hbm_to_vmem [thread:$0]  (!%p1629_p13), %s1625_s25, 16384, %s1633_s27, %s1635_s29, %s1547_s21, %s1547_s21, %s1548_s22  }
  0x2c   : > { %p1129_p9 = scmp.ge.s32.totalorder %s1544_s9, 1  ;;  %p107_p1 = scmp.lt.s32.totalorder %s1544_s9, 3 }
  0x2e   : > { %p108_p3 = pnand %p1129_p9, %p107_p1 }
  0x30   : > { %111 = sbr.rel (%p108_p3) target bundleno = 245 (0xf5), region = 24 }
  0x37   : > { %s1666_s23 = sand.u32 1, %s1536_s7  }
  0x38   : > { %s1130_s24 = sshll.u32 %s1666_s23, 10  ;;  %s114_s26 = scalar_lea.sflag [#allocation3], %s1666_s23 }
  0x39   : > { %s1672_s30 = scalar_lea.vmem [#allocation2], %s1130_s24 }
  0x3a   : > { %1523 = dma.done.wait (%p1605_p6), %s114_s26, 16384  }
  0x3b   : > { %1525 = vsyncadd (%p1605_p6), %s114_s26, 4294950912  ;;  %v1679_v0 = vld [vmem:[%s1672_s30] sm:$0xff]  ;;  %v1682_v1 = vld [vmem:[%s1672_s30 + $0x8] sm:$0xff]  ;;  %s1936_s17 = scalar_lea.vmem [#allocation5], %s1130_s24  ;;  %s1141_s25 = sshll.u32 %s1583_s10, 14 }
  0x3c   : > { %v1685_v2 = vld [vmem:[%s1672_s30 + $0x10] sm:$0xff]  ;;  %v266_v3 = vmul.f32 0.5, %v1679_v0  ;;  %v267_v4 = vmul.f32 0.5, %v1682_v1  ;;  %v1691_v6 = vld [vmem:[%s1672_s30 + $0x18] sm:$0xff]  ;;  %v1694_v7 = vld [vmem:[%s1672_s30 + $0x20] sm:$0xff]  ;;  %s1049_s27 = sshll.u32 %s1936_s17, 4  ;;  %s2553_s2 = scalar_lea.hbm %s2604_s1, %s1141_s25  ;;  %s2555_s27 = int_to_ptr.vmem [resolvable:$true] %s1049_s27 }
  0x3d   : > { %v268_v5 = vmul.f32 0.5, %v1685_v2  ;;  %v1697_v8 = vld [vmem:[%s1672_s30 + $0x28] sm:$0xff]  ;;  %v269_v9 = vmul.f32 0.5, %v1691_v6  ;;  %v270_v10 = vmul.f32 0.5, %v1694_v7  ;;  %v1703_v12 = vld [vmem:[%s1672_s30 + $0x30] sm:$0xff]  ;;  %v1706_v13 = vld [vmem:[%s1672_s30 + $0x38] sm:$0xff] }
  0x3e   : > { %v271_v11 = vmul.f32 0.5, %v1697_v8  ;;  %v1709_v14 = vld [vmem:[%s1672_s30 + $0x40] sm:$0xff]  ;;  %1192 = vtanh.f32 %v266_v3  ;;  %v272_v15 = vmul.f32 0.5, %v1703_v12  ;;  %v273_v16 = vmul.f32 0.5, %v1706_v13  ;;  %v1715_v18 = vld [vmem:[%s1672_s30 + $0x48] sm:$0xff]  ;;  %v1718_v19 = vld [vmem:[%s1672_s30 + $0x50] sm:$0xff] }
  0x3f   : > { %v274_v17 = vmul.f32 0.5, %v1709_v14  ;;  %v1721_v20 = vld [vmem:[%s1672_s30 + $0x58] sm:$0xff]  ;;  %1194 = vtanh.f32 %v267_v4  ;;  %v275_v21 = vmul.f32 0.5, %v1715_v18  ;;  %v276_v22 = vmul.f32 0.5, %v1718_v19  ;;  %v1729_v24 = vld [vmem:[%s1672_s30 + $0x60] sm:$0xff]  ;;  %v1732_v25 = vld [vmem:[%s1672_s30 + $0x68] sm:$0xff] }
  0x40   : > { %v1726_v23 = vmul.f32 0.5, %v1721_v20  ;;  %v1735_v26 = vld [vmem:[%s1672_s30 + $0x70] sm:$0xff]  ;;  %1196 = vtanh.f32 %v268_v5  ;;  %v1738_v27 = vmul.f32 0.5, %v1729_v24  ;;  %v1741_v28 = vmul.f32 0.5, %v1732_v25  ;;  %v1747_v30 = vld [vmem:[%s1672_s30 + $0x78] sm:$0xff]  ;;  %v1750_v31 = vld [vmem:[%s1672_s30 + $0x80] sm:$0xff] }
  0x41   : > { %v1744_v29 = vmul.f32 0.5, %v1735_v26  ;;  %v1753_v32 = vld [vmem:[%s1672_s30 + $0x88] sm:$0xff]  ;;  %1198 = vtanh.f32 %v269_v9  ;;  %v1756_v33 = vmul.f32 0.5, %v1747_v30  ;;  %v1759_v34 = vmul.f32 0.5, %v1750_v31  ;;  %v1765_v36 = vld [vmem:[%s1672_s30 + $0x90] sm:$0xff]  ;;  %v1768_v37 = vld [vmem:[%s1672_s30 + $0x98] sm:$0xff] }
  0x42   : > { %v1762_v35 = vmul.f32 0.5, %v1753_v32  ;;  %v1771_v38 = vld [vmem:[%s1672_s30 + $0xa0] sm:$0xff]  ;;  %1200 = vtanh.f32 %v270_v10  ;;  %v1774_v39 = vmul.f32 0.5, %v1765_v36  ;;  %v1777_v40 = vmul.f32 0.5, %v1768_v37  ;;  %v1783_v42 = vld [vmem:[%s1672_s30 + $0xa8] sm:$0xff]  ;;  %v1786_v43 = vld [vmem:[%s1672_s30 + $0xb0] sm:$0xff] }
  0x43   : > { %v1780_v41 = vmul.f32 0.5, %v1771_v38  ;;  %v1789_v44 = vld [vmem:[%s1672_s30 + $0xb8] sm:$0xff]  ;;  %1202 = vtanh.f32 %v271_v11  ;;  %v1792_v45 = vmul.f32 0.5, %v1783_v42  ;;  %v1795_v46 = vmul.f32 0.5, %v1786_v43  ;;  %v1801_v48 = vld [vmem:[%s1672_s30 + $0xc0] sm:$0xff]  ;;  %v1804_v49 = vld [vmem:[%s1672_s30 + $0xc8] sm:$0xff] }
  0x44   : > { %2632 = vst [vmem:[#allocation8_spill] sm:$0xff] %v1789_v44  ;;  %v1798_v47 = vmul.f32 0.5, %v1789_v44  ;;  %2633 = vst [vmem:[#allocation9_spill] sm:$0xff] %v1801_v48  ;;  %v1807_v50 = vld [vmem:[%s1672_s30 + $0xd0] sm:$0xff]  ;;  %1204 = vtanh.f32 %v272_v15  ;;  %v1810_v51 = vmul.f32 0.5, %v1801_v48  ;;  %v1813_v52 = vmul.f32 0.5, %v1804_v49 }
  0x45   : > { %2634 = vst [vmem:[#allocation10_spill] sm:$0xff] %v1804_v49  ;;  %2635 = vst [vmem:[#allocation11_spill] sm:$0xff] %v1807_v50  ;;  %v1816_v53 = vmul.f32 0.5, %v1807_v50  ;;  %v1819_v54 = vld [vmem:[%s1672_s30 + $0xd8] sm:$0xff]  ;;  %v1822_v55 = vld [vmem:[%s1672_s30 + $0xe0] sm:$0xff]  ;;  %1206 = vtanh.f32 %v273_v16  ;;  %s1035_s10 = scalar_lea.sflag [#allocation4], %s1666_s23 }
  0x46   : > { %2636 = vst [vmem:[#allocation12_spill] sm:$0xff] %v1819_v54  ;;  %2637 = vst [vmem:[#allocation13_spill] sm:$0xff] %v1822_v55  ;;  %v1825_v56 = vld [vmem:[%s1672_s30 + $0xe8] sm:$0xff]  ;;  %v1828_v57 = vmul.f32 0.5, %v1819_v54  ;;  %v1831_v58 = vmul.f32 0.5, %v1822_v55  ;;  %v1837_v60 = vld [vmem:[%s1672_s30 + $0xf0] sm:$0xff]  ;;  %1208 = vtanh.f32 %v274_v17 }
  0x47   : > { %2638 = vst [vmem:[#allocation14_spill] sm:$0xff] %v1825_v56  ;;  %v1834_v59 = vmul.f32 0.5, %v1825_v56  ;;  %2639 = vst [vmem:[#allocation15_spill] sm:$0xff] %v1837_v60  ;;  %v1840_v61 = vld [vmem:[%s1672_s30 + $0xf8] sm:$0xff]  ;;  %v1843_v62 = vld [vmem:[%s1672_s30 + $0x100] sm:$0xff]  ;;  %v1846_v63 = vmul.f32 0.5, %v1837_v60  ;;  %1210 = vtanh.f32 %v275_v21 }
  0x48   : > { %2640 = vst [vmem:[#allocation16_spill] sm:$0xff] %v1840_v61  ;;  %2641 = vst [vmem:[#allocation17_spill] sm:$0xff] %v1843_v62  ;;  %v1849_v3 = vmul.f32 0.5, %v1840_v61  ;;  %v1852_v4 = vmul.f32 0.5, %v1843_v62  ;;  %v1855_v5 = vld [vmem:[%s1672_s30 + $0x108] sm:$0xff]  ;;  %v1858_v9 = vld [vmem:[%s1672_s30 + $0x110] sm:$0xff]  ;;  %v1193_v60 = vpop.eup %1192  ;;  %1212 = vtanh.f32 %v276_v22 }
  0x49   : > { %2642 = vst [vmem:[#allocation18_spill] sm:$0xff] %v1855_v5  ;;  %2643 = vst [vmem:[#allocation19_spill] sm:$0xff] %v1858_v9  ;;  %v1861_v10 = vld [vmem:[%s1672_s30 + $0x118] sm:$0xff]  ;;  %v1864_v11 = vmul.f32 0.5, %v1855_v5  ;;  %v1867_v15 = vmul.f32 0.5, %v1858_v9  ;;  %v1873_v17 = vld [vmem:[%s1672_s30 + $0x120] sm:$0xff]  ;;  %v1195_v54 = vpop.eup %1194  ;;  %1214 = vtanh.f32 %v1726_v23 }
  0x4a   : > { %2644 = vst [vmem:[#allocation20_spill] sm:$0xff] %v1861_v10  ;;  %v1870_v16 = vmul.f32 0.5, %v1861_v10  ;;  %2645 = vst [vmem:[#allocation21_spill] sm:$0xff] %v1873_v17  ;;  %v1876_v62 = vld [vmem:[%s1672_s30 + $0x128] sm:$0xff]  ;;  %v1879_v61 = vld [vmem:[%s1672_s30 + $0x130] sm:$0xff]  ;;  %v1882_v21 = vmul.f32 0.5, %v1873_v17  ;;  %v1197_v48 = vpop.eup %1196  ;;  %1216 = vtanh.f32 %v1738_v27 }
  0x4b   : > { %2646 = vst [vmem:[#allocation22_spill] sm:$0xff] %v1876_v62  ;;  %2647 = vst [vmem:[#allocation23_spill] sm:$0xff] %v1879_v61  ;;  %v1885_v9 = vmul.f32 0.5, %v1876_v62  ;;  %v1888_v10 = vmul.f32 0.5, %v1879_v61  ;;  %v1891_v5 = vld [vmem:[%s1672_s30 + $0x138] sm:$0xff]  ;;  %v1894_v56 = vld [vmem:[%s1672_s30 + $0x140] sm:$0xff]  ;;  %1218 = vtanh.f32 %v1741_v28 }
  0x4c   : > { %2650 = vst [vmem:[#allocation26_spill] sm:$0xff] %v1891_v5  ;;  %2651 = vst [vmem:[#allocation27_spill] sm:$0xff] %v1894_v56  ;;  %v1897_v55 = vld [vmem:[%s1672_s30 + $0x148] sm:$0xff]  ;;  %v522_v50 = vmul.f32 0.5, %v1193_v60  ;;  %v1901_v22 = vmul.f32 0.5, %v1891_v5  ;;  %v1904_v17 = vmul.f32 0.5, %v1894_v56  ;;  %v1199_v5 = vpop.eup %1198  ;;  %1220 = vtanh.f32 %v1744_v29 }
  0x4d   : > { %2648 = vst [vmem:[#allocation24_spill] sm:$0xff] %v1885_v9  ;;  %2649 = vst [vmem:[#allocation25_spill] sm:$0xff] %v1888_v10  ;;  %v1907_v62 = vld [vmem:[%s1672_s30 + $0x150] sm:$0xff]  ;;  %v1910_v61 = vld [vmem:[%s1672_s30 + $0x158] sm:$0xff]  ;;  %v523_v10 = vmul.f32 0.5, %v1195_v54  ;;  %v1917_v60 = vmul.f32 0.5, %v1897_v55  ;;  %v1201_v44 = vpop.eup %1200  ;;  %1222 = vtanh.f32 %v1756_v33 }
  0x4e   : > { %2652 = vst [vmem:[#allocation28_spill] sm:$0xff] %v1897_v55  ;;  %2653 = vst [vmem:[#allocation29_spill] sm:$0xff] %v1901_v22  ;;  %v1913_v49 = vld [vmem:[%s1672_s30 + $0x160] sm:$0xff]  ;;  %v1920_v23 = vmul.f32 0.5, %v1907_v62  ;;  %v650_v22 = vadd.f32 0.5, %v522_v50  ;;  %v524_v56 = vmul.f32 0.5, %v1197_v48  ;;  %v1203_v55 = vpop.eup %1202  ;;  %1224 = vtanh.f32 %v1759_v34 }
  0x4f   : > { %2654 = vst [vmem:[#allocation30_spill] sm:$0xff] %v1904_v17  ;;  %2655 = vst [vmem:[#allocation31_spill] sm:$0xff] %v1907_v62  ;;  %v1924_v17 = vmul.f32 0.5, %v1910_v61  ;;  %v651_v9 = vadd.f32 0.5, %v523_v10  ;;  %v525_v54 = vmul.f32 0.5, %v1199_v5  ;;  %v1928_v27 = vmul.f32 0.5, %v1913_v49  ;;  %v1205_v28 = vpop.eup %1204 }
  0x50   : > { %2656 = vst [vmem:[#allocation32_spill] sm:$0xff] %v1910_v61  ;;  %2657 = vst [vmem:[#allocation33_spill] sm:$0xff] %v1920_v23  ;;  %v778_v62 = vmul.f32 %v650_v22, %v1679_v0  ;;  %v652_v23 = vadd.f32 0.5, %v524_v56  ;;  %v526_v50 = vmul.f32 0.5, %v1201_v44  ;;  %v1207_v5 = vpop.eup %1206  ;;  %v528_v33 = vmul.f32 0.5, %v1205_v28  ;;  %s1478_s3 = scalar_lea.vmem %s2555_s27, 16384 }
  0x51   : > { %2658 = vst [vmem:[#allocation34_spill] sm:$0xff] %v1924_v17  ;;  %v779_v48 = vmul.f32 %v651_v9, %v1682_v1  ;;  %v653_v61 = vadd.f32 0.5, %v525_v54  ;;  %v527_v17 = vmul.f32 0.5, %v1203_v55  ;;  %1226 = vtanh.f32 %v1762_v35  ;;  %v1209_v1 = vpop.eup %1208  ;;  %p1479_p6 = scmp.ne.s32.totalorder %s2555_s27, %s1478_s3  ;;  %p2686_p11 = scmp.ne.s32.totalorder %s2629_s18, 0 }
  0x52   : > { %906 = vst [vmem:[%s1936_s17] sm:$0xff] %v778_v62  ;;  %v780_v0 = vmul.f32 %v652_v23, %v1685_v2  ;;  %v654_v29 = vadd.f32 0.5, %v526_v50  ;;  %v529_v55 = vmul.f32 0.5, %v1207_v5  ;;  %1228 = vtanh.f32 %v1774_v39  ;;  %v1211_v56 = vpop.eup %1210  ;;  %s1549_s4 = smov [#allocation5]  }
  0x53   : > { %907 = vst [vmem:[%s1936_s17 + $0x8] sm:$0xff] %v779_v48  ;;  %v781_v44 = vmul.f32 %v653_v61, %v1691_v6  ;;  %v655_v34 = vadd.f32 0.5, %v527_v17  ;;  %v656_v9 = vadd.f32 0.5, %v528_v33  ;;  %v530_v2 = vmul.f32 0.5, %v1209_v1  ;;  %v1213_v10 = vpop.eup %1212  ;;  %p1480_p12 = pnand %p1479_p6, %p2686_p11  ;;  %s1482_s5 = sshll.u32 %s1549_s4, 4  ;;  %s1483_s5 = int_to_ptr.vmem [resolvable:$false] %s1482_s5 }
  0x54   : > { %908 = vst [vmem:[%s1936_s17 + $0x10] sm:$0xff] %v780_v0  ;;  %v782_v62 = vmul.f32 %v654_v29, %v1694_v7  ;;  %1230 = vtanh.f32 %v1777_v40  ;;  %v657_v22 = vadd.f32 0.5, %v529_v55  ;;  %v531_v6 = vmul.f32 0.5, %v1211_v56  ;;  %v1215_v61 = vpop.eup %1214  ;;  %s1484_s11 = scalar_lea.vmem %s1483_s5, 32768  ;;  %p1485_p8 = scmp.lt.s32.totalorder %s2555_s27, %s1483_s5 }
  0x55   : > { %909 = vst [vmem:[%s1936_s17 + $0x18] sm:$0xff] %v781_v44  ;;  %v783_v35 = vmul.f32 %v655_v34, %v1697_v8  ;;  %1232 = vtanh.f32 %v1780_v41  ;;  %v784_v39 = vmul.f32 %v656_v9, %v1703_v12  ;;  %v658_v17 = vadd.f32 0.5, %v530_v2  ;;  %v1217_v23 = vpop.eup %1216  ;;  %p1481_p13 = pneg %p1480_p12  ;;  %p1486_p10 = scmp.lt.s32.totalorder %s1484_s11, %s1478_s3 }
  0x56   : > { %910 = vst [vmem:[%s1936_s17 + $0x20] sm:$0xff] %v782_v62  ;;  %v532_v7 = vmul.f32 0.5, %v1213_v10  ;;  %1234 = vtanh.f32 %v1792_v45  ;;  %v785_v40 = vmul.f32 %v657_v22, %v1706_v13  ;;  %v659_v54 = vadd.f32 0.5, %v531_v6  ;;  %v1219_v50 = vpop.eup %1218 }
  0x57   : > { %911 = vst [vmem:[%s1936_s17 + $0x28] sm:$0xff] %v783_v35  ;;  %v533_v8 = vmul.f32 0.5, %v1215_v61  ;;  %1236 = vtanh.f32 %v1795_v46  ;;  %912 = vst [vmem:[%s1936_s17 + $0x30] sm:$0xff] %v784_v39  ;;  %v786_v41 = vmul.f32 %v658_v17, %v1709_v14  ;;  %v534_v12 = vmul.f32 0.5, %v1217_v23  ;;  %v1221_v48 = vpop.eup %1220  ;;  %p1487_p0 = por %p1486_p10, %p1485_p8 }
  0x58   : > { %v660_v28 = vadd.f32 0.5, %v532_v7  ;;  %1238 = vtanh.f32 %v1798_v47  ;;  %913 = vst [vmem:[%s1936_s17 + $0x38] sm:$0xff] %v785_v40  ;;  %v787_v45 = vmul.f32 %v659_v54, %v1715_v18  ;;  %v535_v13 = vmul.f32 0.5, %v1219_v50  ;;  %v1223_v0 = vpop.eup %1222 }
  0x59   : > { %v661_v5 = vadd.f32 0.5, %v533_v8  ;;  %1240 = vtanh.f32 %v1810_v51  ;;  %914 = vst [vmem:[%s1936_s17 + $0x40] sm:$0xff] %v786_v41  ;;  %v662_v29 = vadd.f32 0.5, %v534_v12  ;;  %v536_v14 = vmul.f32 0.5, %v1221_v48  ;;  %v1225_v33 = vpop.eup %1224  ;;  %v2659_v12 = vld [vmem:[#allocation24_spill] sm:$0xff]  ;;  %p1488_p2 = pnand %p1487_p0, %p1481_p13 }
  0x5a   : > { %v788_v46 = vmul.f32 %v660_v28, %v1718_v19  ;;  %1242 = vtanh.f32 %v1813_v52  ;;  %915 = vst [vmem:[%s1936_s17 + $0x48] sm:$0xff] %v787_v45  ;;  %v663_v1 = vadd.f32 0.5, %v535_v13  ;;  %v537_v18 = vmul.f32 0.5, %v1223_v0  ;;  %v2661_v13 = vld [vmem:[#allocation25_spill] sm:$0xff] }
  0x5b   : > { %v789_v47 = vmul.f32 %v661_v5, %v1721_v20  ;;  %1244 = vtanh.f32 %v1816_v53  ;;  %v1227_v44 = vpop.eup %1226  ;;  %v790_v51 = vmul.f32 %v662_v29, %v1729_v24  ;;  %v664_v34 = vadd.f32 0.5, %v536_v14  ;;  %v2663_v14 = vld [vmem:[#allocation29_spill] sm:$0xff] }
  0x5c   : > { %916 = vst [vmem:[%s1936_s17 + $0x50] sm:$0xff] %v788_v46  ;;  %v538_v19 = vmul.f32 0.5, %v1225_v33  ;;  %1246 = vtanh.f32 %v1828_v57  ;;  %v1229_v55 = vpop.eup %1228  ;;  %v791_v52 = vmul.f32 %v663_v1, %v1732_v25  ;;  %v665_v56 = vadd.f32 0.5, %v537_v18 }
  0x5d   : > { %917 = vst [vmem:[%s1936_s17 + $0x58] sm:$0xff] %v789_v47  ;;  %v539_v20 = vmul.f32 0.5, %v1227_v44  ;;  %1248 = vtanh.f32 %v1831_v58  ;;  %918 = vst [vmem:[%s1936_s17 + $0x60] sm:$0xff] %v790_v51  ;;  %v792_v53 = vmul.f32 %v664_v34, %v1735_v26  ;;  %v540_v24 = vmul.f32 0.5, %v1229_v55  ;;  %v2664_v47 = vld [vmem:[#allocation10_spill] sm:$0xff] }
  0x5e   : > { %v1231_v62 = vpop.eup %1230  ;;  %v666_v9 = vadd.f32 0.5, %v538_v19  ;;  %1250 = vtanh.f32 %v1834_v59  ;;  %919 = vst [vmem:[%s1936_s17 + $0x68] sm:$0xff] %v791_v52  ;;  %v793_v57 = vmul.f32 %v665_v56, %v1747_v30  ;;  %v2665_v51 = vld [vmem:[#allocation30_spill] sm:$0xff]  ;;  %v2666_v19 = vld [vmem:[#allocation11_spill] sm:$0xff] }
  0x5f   : > { %v1233_v2 = vpop.eup %1232  ;;  %v667_v10 = vadd.f32 0.5, %v539_v20  ;;  %v541_v25 = vmul.f32 0.5, %v1231_v62  ;;  %1252 = vtanh.f32 %v1846_v63  ;;  %920 = vst [vmem:[%s1936_s17 + $0x70] sm:$0xff] %v792_v53  ;;  %v668_v22 = vadd.f32 0.5, %v540_v24  ;;  %v2667_v62 = vld [vmem:[#allocation12_spill] sm:$0xff] }
  0x60   : > { %v1235_v35 = vpop.eup %1234  ;;  %v794_v58 = vmul.f32 %v666_v9, %v1750_v31  ;;  %v542_v26 = vmul.f32 0.5, %v1233_v2  ;;  %1254 = vtanh.f32 %v1849_v3  ;;  %921 = vst [vmem:[%s1936_s17 + $0x78] sm:$0xff] %v793_v57  ;;  %v2668_v2 = vld [vmem:[#allocation33_spill] sm:$0xff] }
  0x61   : > { %v1237_v6 = vpop.eup %1236  ;;  %v795_v59 = vmul.f32 %v667_v10, %v1753_v32  ;;  %v669_v61 = vadd.f32 0.5, %v541_v25  ;;  %v543_v30 = vmul.f32 0.5, %v1235_v35  ;;  %1256 = vtanh.f32 %v1852_v4  ;;  %v2017_v57 = vld [vmem:[%s1672_s30 + $0x168] sm:$0xff] }
  0x62   : > { %v1239_v39 = vpop.eup %1238  ;;  %922 = vst [vmem:[%s1936_s17 + $0x80] sm:$0xff] %v794_v58  ;;  %v796_v63 = vmul.f32 %v668_v22, %v1765_v36  ;;  %v670_v17 = vadd.f32 0.5, %v542_v26  ;;  %v544_v31 = vmul.f32 0.5, %v1237_v6  ;;  %1258 = vtanh.f32 %v1864_v11  ;;  %v2669_v25 = vld [vmem:[#allocation13_spill] sm:$0xff]  ;;  %v2670_v26 = vld [vmem:[#allocation34_spill] sm:$0xff] }
  0x63   : > { %v1241_v7 = vpop.eup %1240  ;;  %923 = vst [vmem:[%s1936_s17 + $0x88] sm:$0xff] %v795_v59  ;;  %v797_v3 = vmul.f32 %v669_v61, %v1768_v37  ;;  %v671_v23 = vadd.f32 0.5, %v543_v30  ;;  %v545_v32 = vmul.f32 0.5, %v1239_v39  ;;  %1260 = vtanh.f32 %v1867_v15  ;;  %v2671_v59 = vld [vmem:[#allocation14_spill] sm:$0xff] }
  0x64   : > { %v1243_v40 = vpop.eup %1242  ;;  %924 = vst [vmem:[%s1936_s17 + $0x90] sm:$0xff] %v796_v63  ;;  %v798_v4 = vmul.f32 %v670_v17, %v1771_v38  ;;  %v672_v54 = vadd.f32 0.5, %v544_v31  ;;  %v546_v36 = vmul.f32 0.5, %v1241_v7  ;;  %1262 = vtanh.f32 %v1870_v16  ;;  %v2660_v16 = vld [vmem:[#allocation8_spill] sm:$0xff]  ;;  %v2672_v17 = vld [vmem:[#allocation15_spill] sm:$0xff] }
  0x65   : > { %v1245_v8 = vpop.eup %1244  ;;  %925 = vst [vmem:[%s1936_s17 + $0x98] sm:$0xff] %v797_v3  ;;  %v799_v11 = vmul.f32 %v671_v23, %v1783_v42  ;;  %v673_v50 = vadd.f32 0.5, %v545_v32  ;;  %v547_v37 = vmul.f32 0.5, %v1243_v40  ;;  %1264 = vtanh.f32 %v1882_v21  ;;  %v2662_v21 = vld [vmem:[#allocation9_spill] sm:$0xff]  ;;  %v2673_v40 = vld [vmem:[#allocation16_spill] sm:$0xff] }
  0x66   : > { %v1247_v41 = vpop.eup %1246  ;;  %926 = vst [vmem:[%s1936_s17 + $0xa0] sm:$0xff] %v798_v4  ;;  %v800_v15 = vmul.f32 %v672_v54, %v1786_v43  ;;  %v674_v28 = vadd.f32 0.5, %v546_v36  ;;  %v548_v38 = vmul.f32 0.5, %v1245_v8  ;;  %1266 = vtanh.f32 %v2659_v12  ;;  %v2675_v12 = vld [vmem:[#allocation18_spill] sm:$0xff] }
  0x67   : > { %v1249_v48 = vpop.eup %1248  ;;  %927 = vst [vmem:[%s1936_s17 + $0xa8] sm:$0xff] %v799_v11  ;;  %v801_v45 = vmul.f32 %v673_v50, %v2660_v16  ;;  %v675_v5 = vadd.f32 0.5, %v547_v37  ;;  %v549_v42 = vmul.f32 0.5, %v1247_v41  ;;  %1268 = vtanh.f32 %v2661_v13  ;;  %v2674_v50 = vld [vmem:[#allocation17_spill] sm:$0xff] }
  0x68   : > { %v1251_v0 = vpop.eup %1250  ;;  %928 = vst [vmem:[%s1936_s17 + $0xb0] sm:$0xff] %v800_v15  ;;  %v802_v46 = vmul.f32 %v674_v28, %v2662_v21  ;;  %v676_v29 = vadd.f32 0.5, %v548_v38  ;;  %v550_v43 = vmul.f32 0.5, %v1249_v48  ;;  %1270 = vtanh.f32 %v2663_v14  ;;  %v2040_v28 = vld [vmem:[%s1672_s30 + $0x180] sm:$0xff] }
  0x69   : > { %v1253_v33 = vpop.eup %1252  ;;  %929 = vst [vmem:[%s1936_s17 + $0xb8] sm:$0xff] %v801_v45  ;;  %v803_v1 = vmul.f32 %v675_v5, %v2664_v47  ;;  %v677_v18 = vadd.f32 0.5, %v549_v42  ;;  %v551_v44 = vmul.f32 0.5, %v1251_v0  ;;  %1272 = vtanh.f32 %v2665_v51  ;;  %v2676_v42 = vld [vmem:[#allocation19_spill] sm:$0xff]  ;;  %v2678_v51 = vld [vmem:[#allocation21_spill] sm:$0xff] }
  0x6a   : > { %v1255_v34 = vpop.eup %1254  ;;  %930 = vst [vmem:[%s1936_s17 + $0xc0] sm:$0xff] %v802_v46  ;;  %v804_v55 = vmul.f32 %v676_v29, %v2666_v19  ;;  %v678_v52 = vadd.f32 0.5, %v550_v43  ;;  %v552_v56 = vmul.f32 0.5, %v1253_v33  ;;  %1274 = vtanh.f32 %v1917_v60  ;;  %v2023_v60 = vld [vmem:[%s1672_s30 + $0x170] sm:$0xff]  ;;  %v2677_v43 = vld [vmem:[#allocation20_spill] sm:$0xff] }
  0x6b   : > { %v1257_v20 = vpop.eup %1256  ;;  %931 = vst [vmem:[%s1936_s17 + $0xc8] sm:$0xff] %v803_v1  ;;  %v805_v53 = vmul.f32 %v677_v18, %v2667_v62  ;;  %v679_v9 = vadd.f32 0.5, %v551_v44  ;;  %v553_v24 = vmul.f32 0.5, %v1255_v34  ;;  %1276 = vtanh.f32 %v2668_v2  ;;  %v2051_v18 = vld [vmem:[%s1672_s30 + $0x188] sm:$0xff]  ;;  %v2680_v2 = vld [vmem:[#allocation23_spill] sm:$0xff] }
  0x6c   : > { %v1259_v10 = vpop.eup %1258  ;;  %932 = vst [vmem:[%s1936_s17 + $0xd0] sm:$0xff] %v804_v55  ;;  %v806_v35 = vmul.f32 %v678_v52, %v2669_v25  ;;  %v680_v58 = vadd.f32 0.5, %v552_v56  ;;  %v554_v22 = vmul.f32 0.5, %v1257_v20  ;;  %1278 = vtanh.f32 %v2670_v26  ;;  %v2056_v52 = vld [vmem:[%s1672_s30 + $0x190] sm:$0xff] }
  0x6d   : > { %v1261_v6 = vpop.eup %1260  ;;  %933 = vst [vmem:[%s1936_s17 + $0xd8] sm:$0xff] %v805_v53  ;;  %v807_v61 = vmul.f32 %v679_v9, %v2671_v59  ;;  %v681_v30 = vadd.f32 0.5, %v553_v24  ;;  %v555_v39 = vmul.f32 0.5, %v1259_v10  ;;  %1280 = vtanh.f32 %v1928_v27  ;;  %v2035_v27 = vld [vmem:[%s1672_s30 + $0x178] sm:$0xff]  ;;  %v2679_v20 = vld [vmem:[#allocation22_spill] sm:$0xff] }
  0x6e   : > { %v1263_v63 = vpop.eup %1262  ;;  %934 = vst [vmem:[%s1936_s17 + $0xe0] sm:$0xff] %v806_v35  ;;  %v808_v31 = vmul.f32 %v680_v58, %v2672_v17  ;;  %v682_v7 = vadd.f32 0.5, %v554_v22  ;;  %v556_v3 = vmul.f32 0.5, %v1261_v6  ;;  %v311_v23 = vmul.f32 0.5, %v2017_v57  ;;  %v2064_v22 = vld [vmem:[%s1672_s30 + $0x198] sm:$0xff]  ;;  %v2681_v6 = vld [vmem:[#allocation26_spill] sm:$0xff] }
  0x6f   : > { %v1265_v32 = vpop.eup %1264  ;;  %935 = vst [vmem:[%s1936_s17 + $0xe8] sm:$0xff] %v807_v61  ;;  %v809_v4 = vmul.f32 %v681_v30, %v2673_v40  ;;  %v683_v54 = vadd.f32 0.5, %v555_v39  ;;  %v557_v36 = vmul.f32 0.5, %v1263_v63  ;;  %v312_v8 = vmul.f32 0.5, %v2023_v60  ;;  %v2070_v63 = vld [vmem:[%s1672_s30 + $0x1a0] sm:$0xff]  ;;  %v2073_v17 = vld [vmem:[%s1672_s30 + $0x1a8] sm:$0xff] }
  0x70   : > { %v1267_v11 = vpop.eup %1266  ;;  %936 = vst [vmem:[%s1936_s17 + $0xf0] sm:$0xff] %v808_v31  ;;  %v810_v37 = vmul.f32 %v682_v7, %v2674_v50  ;;  %v684_v41 = vadd.f32 0.5, %v556_v3  ;;  %v558_v15 = vmul.f32 0.5, %v1265_v32  ;;  %1282 = vtanh.f32 %v311_v23  ;;  %v2682_v31 = vld [vmem:[#allocation27_spill] sm:$0xff]  ;;  %v2078_v32 = vld [vmem:[%s1672_s30 + $0x1b0] sm:$0xff]  ;;  %v2683_v40 = vld [vmem:[#allocation28_spill] sm:$0xff] }
  0x71   : > { %v1269_v38 = vpop.eup %1268  ;;  %937 = vst [vmem:[%s1936_s17 + $0xf8] sm:$0xff] %v809_v4  ;;  %v811_v48 = vmul.f32 %v683_v54, %v2675_v12  ;;  %v685_v16 = vadd.f32 0.5, %v557_v36  ;;  %v559_v45 = vmul.f32 0.5, %v1267_v11  ;;  %1284 = vtanh.f32 %v312_v8  ;;  %v2084_v8 = vld [vmem:[%s1672_s30 + $0x1b8] sm:$0xff]  ;;  %v2091_v12 = vld [vmem:[%s1672_s30 + $0x1c0] sm:$0xff] }
  0x72   : > { %v1271_v5 = vpop.eup %1270  ;;  %938 = vst [vmem:[%s1936_s17 + $0x100] sm:$0xff] %v810_v37  ;;  %v812_v13 = vmul.f32 %v684_v41, %v2676_v42  ;;  %v686_v0 = vadd.f32 0.5, %v558_v15  ;;  %v560_v21 = vmul.f32 0.5, %v1269_v38  ;;  %v313_v46 = vmul.f32 0.5, %v2035_v27  ;;  %v2684_v50 = vld [vmem:[#allocation31_spill] sm:$0xff] }
  0x73   : > { %v1273_v29 = vpop.eup %1272  ;;  %939 = vst [vmem:[%s1936_s17 + $0x108] sm:$0xff] %v811_v48  ;;  %v813_v14 = vmul.f32 %v685_v16, %v2677_v43  ;;  %v687_v33 = vadd.f32 0.5, %v559_v45  ;;  %v561_v47 = vmul.f32 0.5, %v1271_v5  ;;  %v314_v1 = vmul.f32 0.5, %v2040_v28  ;;  %v2094_v48 = vld [vmem:[%s1672_s30 + $0x1c8] sm:$0xff]  ;;  %v2685_v45 = vld [vmem:[#allocation32_spill] sm:$0xff] }
  0x74   : > { %v1275_v44 = vpop.eup %1274  ;;  %940 = vst [vmem:[%s1936_s17 + $0x110] sm:$0xff] %v812_v13  ;;  %v814_v34 = vmul.f32 %v686_v0, %v2678_v51  ;;  %v688_v19 = vadd.f32 0.5, %v560_v21  ;;  %v562_v55 = vmul.f32 0.5, %v1273_v29  ;;  %1286 = vtanh.f32 %v313_v46  ;;  %v2100_v0 = vld [vmem:[%s1672_s30 + $0x1d0] sm:$0xff]  ;;  %v2103_v21 = vld [vmem:[%s1672_s30 + $0x1d8] sm:$0xff] }
  0x75   : > { %v1277_v56 = vpop.eup %1276  ;;  %941 = vst [vmem:[%s1936_s17 + $0x118] sm:$0xff] %v813_v14  ;;  %v815_v62 = vmul.f32 %v687_v33, %v2679_v20  ;;  %v689_v53 = vadd.f32 0.5, %v561_v47  ;;  %v563_v9 = vmul.f32 0.5, %v1275_v44  ;;  %1288 = vtanh.f32 %v314_v1  ;;  %v2109_v14 = vld [vmem:[%s1672_s30 + $0x1e0] sm:$0xff]  ;;  %v2115_v44 = vld [vmem:[%s1672_s30 + $0x1e8] sm:$0xff] }
  0x76   : > { %v1279_v24 = vpop.eup %1278  ;;  %942 = vst [vmem:[%s1936_s17 + $0x120] sm:$0xff] %v814_v34  ;;  %v816_v10 = vmul.f32 %v688_v19, %v2680_v2  ;;  %v690_v25 = vadd.f32 0.5, %v562_v55  ;;  %v564_v35 = vmul.f32 0.5, %v1277_v56  ;;  %v315_v58 = vmul.f32 0.5, %v2051_v18  ;;  %v2121_v55 = vld [vmem:[%s1672_s30 + $0x1f0] sm:$0xff]  ;;  %v2124_v56 = vld [vmem:[%s1672_s30 + $0x1f8] sm:$0xff] }
  0x77   : > { %v1281_v26 = vpop.eup %1280  ;;  %943 = vst [vmem:[%s1936_s17 + $0x128] sm:$0xff] %v815_v62  ;;  %v817_v59 = vmul.f32 %v689_v53, %v2681_v6  ;;  %v691_v61 = vadd.f32 0.5, %v563_v9  ;;  %v565_v30 = vmul.f32 0.5, %v1279_v24  ;;  %v316_v39 = vmul.f32 0.5, %v2056_v52  ;;  %v2129_v24 = vld [vmem:[%s1672_s30 + $0x200] sm:$0xff]  ;;  %v2132_v2 = vld [vmem:[%s1672_s30 + $0x208] sm:$0xff] }
  0x78   : > { %944 = vst [vmem:[%s1936_s17 + $0x130] sm:$0xff] %v816_v10  ;;  %v818_v7 = vmul.f32 %v690_v25, %v2682_v31  ;;  %v692_v3 = vadd.f32 0.5, %v564_v35  ;;  %v566_v23 = vmul.f32 0.5, %v1281_v26  ;;  %1290 = vtanh.f32 %v315_v58  ;;  %v2137_v58 = vld [vmem:[%s1672_s30 + $0x210] sm:$0xff]  ;;  %v2149_v31 = vld [vmem:[%s1672_s30 + $0x220] sm:$0xff] }
  0x79   : > { %945 = vst [vmem:[%s1936_s17 + $0x138] sm:$0xff] %v817_v59  ;;  %v819_v4 = vmul.f32 %v691_v61, %v2683_v40  ;;  %v693_v54 = vadd.f32 0.5, %v565_v30  ;;  %1292 = vtanh.f32 %v316_v39  ;;  %v317_v36 = vmul.f32 0.5, %v2064_v22  ;;  %v2143_v59 = vld [vmem:[%s1672_s30 + $0x218] sm:$0xff] }
  0x7a   : > { %v1283_v11 = vpop.eup %1282  ;;  %946 = vst [vmem:[%s1936_s17 + $0x140] sm:$0xff] %v818_v7  ;;  %v820_v37 = vmul.f32 %v692_v3, %v2684_v50  ;;  %v694_v41 = vadd.f32 0.5, %v566_v23  ;;  %v318_v15 = vmul.f32 0.5, %v2070_v63  ;;  %v319_v38 = vmul.f32 0.5, %v2073_v17  ;;  %v2152_v7 = vld [vmem:[%s1672_s30 + $0x228] sm:$0xff] }
  0x7b   : > { %v1285_v16 = vpop.eup %1284  ;;  %947 = vst [vmem:[%s1936_s17 + $0x148] sm:$0xff] %v819_v4  ;;  %v821_v5 = vmul.f32 %v693_v54, %v2685_v45  ;;  %v567_v42 = vmul.f32 0.5, %v1283_v11  ;;  %1294 = vtanh.f32 %v317_v36  ;;  %v320_v13 = vmul.f32 0.5, %v2078_v32  ;;  %v2157_v54 = vld [vmem:[%s1672_s30 + $0x230] sm:$0xff] }
  0x7c   : > { %948 = vst [vmem:[%s1936_s17 + $0x150] sm:$0xff] %v820_v37  ;;  %v822_v46 = vmul.f32 %v694_v41, %v1913_v49  ;;  %v568_v29 = vmul.f32 0.5, %v1285_v16  ;;  %1296 = vtanh.f32 %v318_v15  ;;  %v321_v43 = vmul.f32 0.5, %v2084_v8  ;;  %v2162_v37 = vld [vmem:[%s1672_s30 + $0x238] sm:$0xff] }
  0x7d   : > { %949 = vst [vmem:[%s1936_s17 + $0x158] sm:$0xff] %v821_v5  ;;  %v695_v33 = vadd.f32 0.5, %v567_v42  ;;  %1298 = vtanh.f32 %v319_v38  ;;  %v322_v47 = vmul.f32 0.5, %v2091_v12  ;;  %v323_v1 = vmul.f32 0.5, %v2094_v48  ;;  %v2170_v42 = vld [vmem:[%s1672_s30 + $0x240] sm:$0xff] }
  0x7e   : > { %v1287_v49 = vpop.eup %1286  ;;  %950 = vst [vmem:[%s1936_s17 + $0x160] sm:$0xff] %v822_v46  ;;  %v696_v51 = vadd.f32 0.5, %v568_v29  ;;  %1300 = vtanh.f32 %v320_v13  ;;  %v324_v34 = vmul.f32 0.5, %v2100_v0  ;;  %v325_v19 = vmul.f32 0.5, %v2103_v21 }
  0x7f   : > { %v1289_v20 = vpop.eup %1288  ;;  %v823_v62 = vmul.f32 %v695_v33, %v2017_v57  ;;  %v569_v53 = vmul.f32 0.5, %v1287_v49  ;;  %1302 = vtanh.f32 %v321_v43  ;;  %v326_v9 = vmul.f32 0.5, %v2109_v14 }
  0x80   : > { %v824_v10 = vmul.f32 %v696_v51, %v2023_v60  ;;  %v570_v25 = vmul.f32 0.5, %v1289_v20  ;;  %1304 = vtanh.f32 %v322_v47  ;;  %v327_v35 = vmul.f32 0.5, %v2115_v44 }
  0x81   : > { %951 = vst [vmem:[%s1936_s17 + $0x168] sm:$0xff] %v823_v62  ;;  %v697_v57 = vadd.f32 0.5, %v569_v53  ;;  %1306 = vtanh.f32 %v323_v1  ;;  %v328_v26 = vmul.f32 0.5, %v2121_v55  ;;  %v329_v6 = vmul.f32 0.5, %v2124_v56 }
  0x82   : > { %v1291_v61 = vpop.eup %1290  ;;  %952 = vst [vmem:[%s1936_s17 + $0x170] sm:$0xff] %v824_v10  ;;  %v698_v60 = vadd.f32 0.5, %v570_v25  ;;  %1308 = vtanh.f32 %v324_v34  ;;  %v330_v30 = vmul.f32 0.5, %v2129_v24  ;;  %v331_v39 = vmul.f32 0.5, %v2132_v2 }
  0x83   : > { %v1293_v3 = vpop.eup %1292  ;;  %v825_v23 = vmul.f32 %v697_v57, %v2035_v27  ;;  %v571_v40 = vmul.f32 0.5, %v1291_v61  ;;  %1310 = vtanh.f32 %v325_v19  ;;  %v332_v4 = vmul.f32 0.5, %v2137_v58 }
  0x84   : > { %v826_v36 = vmul.f32 %v698_v60, %v2040_v28  ;;  %v572_v11 = vmul.f32 0.5, %v1293_v3  ;;  %1312 = vtanh.f32 %v326_v9  ;;  %v333_v50 = vmul.f32 0.5, %v2143_v59 }
  0x85   : > { %v1295_v41 = vpop.eup %1294  ;;  %953 = vst [vmem:[%s1936_s17 + $0x178] sm:$0xff] %v825_v23  ;;  %v699_v15 = vadd.f32 0.5, %v571_v40  ;;  %1314 = vtanh.f32 %v327_v35  ;;  %v334_v27 = vmul.f32 0.5, %v2149_v31  ;;  %v335_v38 = vmul.f32 0.5, %v2152_v7  ;;  %v2187_v40 = vld [vmem:[%s1672_s30 + $0x248] sm:$0xff] }
  0x86   : > { %v1297_v16 = vpop.eup %1296  ;;  %954 = vst [vmem:[%s1936_s17 + $0x180] sm:$0xff] %v826_v36  ;;  %v700_v45 = vadd.f32 0.5, %v572_v11  ;;  %v573_v28 = vmul.f32 0.5, %v1295_v41  ;;  %1316 = vtanh.f32 %v328_v26  ;;  %v336_v5 = vmul.f32 0.5, %v2157_v54 }
  0x87   : > { %v1299_v13 = vpop.eup %1298  ;;  %v827_v46 = vmul.f32 %v699_v15, %v2051_v18  ;;  %v574_v29 = vmul.f32 0.5, %v1297_v16  ;;  %1318 = vtanh.f32 %v329_v6  ;;  %v337_v43 = vmul.f32 0.5, %v2162_v37 }
  0x88   : > { %v1301_v33 = vpop.eup %1300  ;;  %v828_v47 = vmul.f32 %v700_v45, %v2056_v52  ;;  %v701_v1 = vadd.f32 0.5, %v573_v28  ;;  %v575_v49 = vmul.f32 0.5, %v1299_v13  ;;  %1320 = vtanh.f32 %v330_v30 }
  0x89   : > { %v1303_v51 = vpop.eup %1302  ;;  %955 = vst [vmem:[%s1936_s17 + $0x188] sm:$0xff] %v827_v46  ;;  %v702_v34 = vadd.f32 0.5, %v574_v29  ;;  %v576_v19 = vmul.f32 0.5, %v1301_v33  ;;  %1322 = vtanh.f32 %v331_v39  ;;  %v338_v20 = vmul.f32 0.5, %v2170_v42 }
  0x8a   : > { %v1305_v18 = vpop.eup %1304  ;;  %956 = vst [vmem:[%s1936_s17 + $0x190] sm:$0xff] %v828_v47  ;;  %v829_v62 = vmul.f32 %v701_v1, %v2064_v22  ;;  %v703_v53 = vadd.f32 0.5, %v575_v49  ;;  %v577_v9 = vmul.f32 0.5, %v1303_v51  ;;  %1324 = vtanh.f32 %v332_v4  ;;  %v2208_v49 = vld [vmem:[%s1672_s30 + $0x260] sm:$0xff] }
  0x8b   : > { %v1307_v52 = vpop.eup %1306  ;;  %v830_v10 = vmul.f32 %v702_v34, %v2070_v63  ;;  %v704_v25 = vadd.f32 0.5, %v576_v19  ;;  %v578_v35 = vmul.f32 0.5, %v1305_v18  ;;  %1326 = vtanh.f32 %v333_v50  ;;  %v2192_v50 = vld [vmem:[%s1672_s30 + $0x250] sm:$0xff] }
  0x8c   : > { %v1309_v57 = vpop.eup %1308  ;;  %957 = vst [vmem:[%s1936_s17 + $0x198] sm:$0xff] %v829_v62  ;;  %v831_v26 = vmul.f32 %v703_v53, %v2073_v17  ;;  %v705_v6 = vadd.f32 0.5, %v577_v9  ;;  %v579_v61 = vmul.f32 0.5, %v1307_v52  ;;  %1328 = vtanh.f32 %v334_v27 }
  0x8d   : > { %v1311_v22 = vpop.eup %1310  ;;  %958 = vst [vmem:[%s1936_s17 + $0x1a0] sm:$0xff] %v830_v10  ;;  %v832_v60 = vmul.f32 %v704_v25, %v2078_v32  ;;  %v706_v30 = vadd.f32 0.5, %v578_v35  ;;  %v580_v63 = vmul.f32 0.5, %v1309_v57  ;;  %1330 = vtanh.f32 %v335_v38  ;;  %v2219_v35 = vld [vmem:[%s1672_s30 + $0x268] sm:$0xff] }
  0x8e   : > { %v1313_v39 = vpop.eup %1312  ;;  %959 = vst [vmem:[%s1936_s17 + $0x1a8] sm:$0xff] %v831_v26  ;;  %v833_v3 = vmul.f32 %v705_v6, %v2084_v8  ;;  %v707_v23 = vadd.f32 0.5, %v579_v61  ;;  %v581_v17 = vmul.f32 0.5, %v1311_v22  ;;  %1332 = vtanh.f32 %v336_v5  ;;  %v2224_v61 = vld [vmem:[%s1672_s30 + $0x270] sm:$0xff] }
  0x8f   : > { %v1315_v4 = vpop.eup %1314  ;;  %960 = vst [vmem:[%s1936_s17 + $0x1b0] sm:$0xff] %v832_v60  ;;  %v834_v36 = vmul.f32 %v706_v30, %v2091_v12  ;;  %v708_v32 = vadd.f32 0.5, %v580_v63  ;;  %v582_v11 = vmul.f32 0.5, %v1313_v39  ;;  %1334 = vtanh.f32 %v337_v43  ;;  %v2203_v43 = vld [vmem:[%s1672_s30 + $0x258] sm:$0xff] }
  0x90   : > { %v1317_v41 = vpop.eup %1316  ;;  %961 = vst [vmem:[%s1936_s17 + $0x1b8] sm:$0xff] %v833_v3  ;;  %v835_v8 = vmul.f32 %v707_v23, %v2094_v48  ;;  %v709_v15 = vadd.f32 0.5, %v581_v17  ;;  %v583_v27 = vmul.f32 0.5, %v1315_v4  ;;  %1336 = vtanh.f32 %v338_v20  ;;  %v2232_v17 = vld [vmem:[%s1672_s30 + $0x278] sm:$0xff] }
  0x91   : > { %v1319_v38 = vpop.eup %1318  ;;  %962 = vst [vmem:[%s1936_s17 + $0x1c0] sm:$0xff] %v834_v36  ;;  %v836_v16 = vmul.f32 %v708_v32, %v2100_v0  ;;  %v710_v12 = vadd.f32 0.5, %v582_v11  ;;  %v584_v45 = vmul.f32 0.5, %v1317_v41  ;;  %v339_v28 = vmul.f32 0.5, %v2187_v40  ;;  %v2238_v41 = vld [vmem:[%s1672_s30 + $0x280] sm:$0xff] }
  0x92   : > { %v1321_v5 = vpop.eup %1320  ;;  %963 = vst [vmem:[%s1936_s17 + $0x1c8] sm:$0xff] %v835_v8  ;;  %v837_v13 = vmul.f32 %v709_v15, %v2103_v21  ;;  %v711_v48 = vadd.f32 0.5, %v583_v27  ;;  %v585_v46 = vmul.f32 0.5, %v1319_v38  ;;  %v340_v29 = vmul.f32 0.5, %v2192_v50  ;;  %v2246_v38 = vld [vmem:[%s1672_s30 + $0x290] sm:$0xff] }
  0x93   : > { %v1323_v33 = vpop.eup %1322  ;;  %964 = vst [vmem:[%s1936_s17 + $0x1d0] sm:$0xff] %v836_v16  ;;  %v838_v0 = vmul.f32 %v710_v12, %v2109_v14  ;;  %v712_v47 = vadd.f32 0.5, %v584_v45  ;;  %v586_v1 = vmul.f32 0.5, %v1321_v5  ;;  %1338 = vtanh.f32 %v339_v28  ;;  %v2252_v45 = vld [vmem:[%s1672_s30 + $0x298] sm:$0xff] }
  0x94   : > { %v1325_v51 = vpop.eup %1324  ;;  %965 = vst [vmem:[%s1936_s17 + $0x1d8] sm:$0xff] %v837_v13  ;;  %v839_v21 = vmul.f32 %v711_v48, %v2115_v44  ;;  %v713_v34 = vadd.f32 0.5, %v585_v46  ;;  %v587_v19 = vmul.f32 0.5, %v1323_v33  ;;  %1340 = vtanh.f32 %v340_v29  ;;  %v2262_v46 = vld [vmem:[%s1672_s30 + $0x2a8] sm:$0xff] }
  0x95   : > { %v1327_v20 = vpop.eup %1326  ;;  %966 = vst [vmem:[%s1936_s17 + $0x1e0] sm:$0xff] %v838_v0  ;;  %v840_v18 = vmul.f32 %v712_v47, %v2121_v55  ;;  %v714_v14 = vadd.f32 0.5, %v586_v1  ;;  %v588_v62 = vmul.f32 0.5, %v1325_v51  ;;  %v341_v53 = vmul.f32 0.5, %v2203_v43  ;;  %v2268_v47 = vld [vmem:[%s1672_s30 + $0x2b0] sm:$0xff]  ;;  %v2271_v1 = vld [vmem:[%s1672_s30 + $0x2b8] sm:$0xff] }
  0x96   : > { %v1329_v9 = vpop.eup %1328  ;;  %967 = vst [vmem:[%s1936_s17 + $0x1e8] sm:$0xff] %v839_v21  ;;  %v841_v52 = vmul.f32 %v713_v34, %v2124_v56  ;;  %v715_v44 = vadd.f32 0.5, %v587_v19  ;;  %v589_v10 = vmul.f32 0.5, %v1327_v20  ;;  %v342_v25 = vmul.f32 0.5, %v2208_v49 }
  0x97   : > { %v1331_v57 = vpop.eup %1330  ;;  %968 = vst [vmem:[%s1936_s17 + $0x1f0] sm:$0xff] %v840_v18  ;;  %v842_v55 = vmul.f32 %v714_v14, %v2129_v24  ;;  %v716_v26 = vadd.f32 0.5, %v588_v62  ;;  %v590_v6 = vmul.f32 0.5, %v1329_v9  ;;  %1342 = vtanh.f32 %v341_v53  ;;  %v2283_v14 = vld [vmem:[%s1672_s30 + $0x2c8] sm:$0xff] }
  0x98   : > { %v1333_v22 = vpop.eup %1332  ;;  %969 = vst [vmem:[%s1936_s17 + $0x1f8] sm:$0xff] %v841_v52  ;;  %v843_v56 = vmul.f32 %v715_v44, %v2132_v2  ;;  %v717_v60 = vadd.f32 0.5, %v589_v10  ;;  %v591_v30 = vmul.f32 0.5, %v1331_v57  ;;  %1344 = vtanh.f32 %v342_v25  ;;  %v2289_v52 = vld [vmem:[%s1672_s30 + $0x2d0] sm:$0xff]  ;;  %v2292_v44 = vld [vmem:[%s1672_s30 + $0x2d8] sm:$0xff] }
  0x99   : > { %v1335_v63 = vpop.eup %1334  ;;  %970 = vst [vmem:[%s1936_s17 + $0x200] sm:$0xff] %v842_v55  ;;  %v844_v24 = vmul.f32 %v716_v26, %v2137_v58  ;;  %v718_v39 = vadd.f32 0.5, %v590_v6  ;;  %v592_v3 = vmul.f32 0.5, %v1333_v22  ;;  %v343_v23 = vmul.f32 0.5, %v2219_v35  ;;  %v2241_v58 = vld [vmem:[%s1672_s30 + $0x288] sm:$0xff]  ;;  %v2297_v26 = vld [vmem:[%s1672_s30 + $0x2e0] sm:$0xff] }
  0x9a   : > { %v1337_v4 = vpop.eup %1336  ;;  %971 = vst [vmem:[%s1936_s17 + $0x208] sm:$0xff] %v843_v56  ;;  %v845_v2 = vmul.f32 %v717_v60, %v2143_v59  ;;  %v719_v36 = vadd.f32 0.5, %v591_v30  ;;  %v593_v32 = vmul.f32 0.5, %v1335_v63  ;;  %v344_v11 = vmul.f32 0.5, %v2224_v61  ;;  %v2300_v6 = vld [vmem:[%s1672_s30 + $0x2e8] sm:$0xff]  ;;  %v2305_v30 = vld [vmem:[%s1672_s30 + $0x2f0] sm:$0xff] }
  0x9b   : > { %972 = vst [vmem:[%s1936_s17 + $0x210] sm:$0xff] %v844_v24  ;;  %v846_v8 = vmul.f32 %v718_v39, %v2149_v31  ;;  %v720_v15 = vadd.f32 0.5, %v592_v3  ;;  %v594_v27 = vmul.f32 0.5, %v1337_v4  ;;  %1346 = vtanh.f32 %v343_v23  ;;  %v2311_v39 = vld [vmem:[%s1672_s30 + $0x2f8] sm:$0xff] }
  0x9c   : > { %973 = vst [vmem:[%s1936_s17 + $0x218] sm:$0xff] %v845_v2  ;;  %v847_v59 = vmul.f32 %v719_v36, %v2152_v7  ;;  %v721_v16 = vadd.f32 0.5, %v593_v32  ;;  %1348 = vtanh.f32 %v344_v11  ;;  %v345_v12 = vmul.f32 0.5, %v2232_v17  ;;  %v2259_v7 = vld [vmem:[%s1672_s30 + $0x2a0] sm:$0xff]  ;;  %v2320_v36 = vld [vmem:[%s1672_s30 + $0x308] sm:$0xff] }
  0x9d   : > { %v1339_v31 = vpop.eup %1338  ;;  %974 = vst [vmem:[%s1936_s17 + $0x220] sm:$0xff] %v846_v8  ;;  %v848_v28 = vmul.f32 %v720_v15, %v2157_v54  ;;  %v722_v5 = vadd.f32 0.5, %v594_v27  ;;  %v346_v13 = vmul.f32 0.5, %v2238_v41  ;;  %v347_v48 = vmul.f32 0.5, %v2241_v58  ;;  %v2317_v2 = vld [vmem:[%s1672_s30 + $0x300] sm:$0xff]  ;;  %v2325_v27 = vld [vmem:[%s1672_s30 + $0x310] sm:$0xff] }
  0x9e   : > { %v1341_v29 = vpop.eup %1340  ;;  %975 = vst [vmem:[%s1936_s17 + $0x228] sm:$0xff] %v847_v59  ;;  %v849_v33 = vmul.f32 %v721_v16, %v2162_v37  ;;  %v595_v0 = vmul.f32 0.5, %v1339_v31  ;;  %1350 = vtanh.f32 %v345_v12  ;;  %v348_v54 = vmul.f32 0.5, %v2246_v38  ;;  %v2277_v37 = vld [vmem:[%s1672_s30 + $0x2c0] sm:$0xff]  ;;  %v2330_v31 = vld [vmem:[%s1672_s30 + $0x318] sm:$0xff] }
  0x9f   : > { %976 = vst [vmem:[%s1936_s17 + $0x230] sm:$0xff] %v848_v28  ;;  %v850_v51 = vmul.f32 %v722_v5, %v2170_v42  ;;  %v596_v21 = vmul.f32 0.5, %v1341_v29  ;;  %1352 = vtanh.f32 %v346_v13  ;;  %v349_v34 = vmul.f32 0.5, %v2252_v45 }
  0xa0   : > { %977 = vst [vmem:[%s1936_s17 + $0x238] sm:$0xff] %v849_v33  ;;  %v723_v19 = vadd.f32 0.5, %v595_v0  ;;  %1354 = vtanh.f32 %v347_v48  ;;  %v350_v20 = vmul.f32 0.5, %v2259_v7  ;;  %v351_v18 = vmul.f32 0.5, %v2262_v46  ;;  %v2338_v0 = vld [vmem:[%s1672_s30 + $0x320] sm:$0xff] }
  0xa1   : > { %v1343_v42 = vpop.eup %1342  ;;  %978 = vst [vmem:[%s1936_s17 + $0x240] sm:$0xff] %v850_v51  ;;  %v724_v62 = vadd.f32 0.5, %v596_v21  ;;  %1356 = vtanh.f32 %v348_v54  ;;  %v352_v53 = vmul.f32 0.5, %v2268_v47  ;;  %v353_v9 = vmul.f32 0.5, %v2271_v1 }
  0xa2   : > { %v1345_v10 = vpop.eup %1344  ;;  %v851_v25 = vmul.f32 %v723_v19, %v2187_v40  ;;  %v597_v57 = vmul.f32 0.5, %v1343_v42  ;;  %1358 = vtanh.f32 %v349_v34  ;;  %v354_v55 = vmul.f32 0.5, %v2277_v37 }
  0xa3   : > { %v852_v22 = vmul.f32 %v724_v62, %v2192_v50  ;;  %v598_v56 = vmul.f32 0.5, %v1345_v10  ;;  %1360 = vtanh.f32 %v350_v20  ;;  %v355_v60 = vmul.f32 0.5, %v2283_v14 }
  0xa4   : > { %979 = vst [vmem:[%s1936_s17 + $0x248] sm:$0xff] %v851_v25  ;;  %v725_v40 = vadd.f32 0.5, %v597_v57  ;;  %1362 = vtanh.f32 %v351_v18  ;;  %v356_v63 = vmul.f32 0.5, %v2289_v52  ;;  %v357_v24 = vmul.f32 0.5, %v2292_v44 }
  0xa5   : > { %v1347_v3 = vpop.eup %1346  ;;  %980 = vst [vmem:[%s1936_s17 + $0x250] sm:$0xff] %v852_v22  ;;  %v726_v50 = vadd.f32 0.5, %v598_v56  ;;  %1364 = vtanh.f32 %v352_v53  ;;  %v358_v23 = vmul.f32 0.5, %v2297_v26  ;;  %v359_v4 = vmul.f32 0.5, %v2300_v6 }
  0xa6   : > { %v1349_v32 = vpop.eup %1348  ;;  %v853_v11 = vmul.f32 %v725_v40, %v2203_v43  ;;  %v599_v8 = vmul.f32 0.5, %v1347_v3  ;;  %1366 = vtanh.f32 %v353_v9  ;;  %v360_v15 = vmul.f32 0.5, %v2305_v30 }
  0xa7   : > { %v854_v59 = vmul.f32 %v726_v50, %v2208_v49  ;;  %v600_v16 = vmul.f32 0.5, %v1349_v32  ;;  %1368 = vtanh.f32 %v354_v55  ;;  %v361_v12 = vmul.f32 0.5, %v2311_v39 }
  0xa8   : > { %v1351_v28 = vpop.eup %1350  ;;  %981 = vst [vmem:[%s1936_s17 + $0x258] sm:$0xff] %v853_v11  ;;  %v727_v5 = vadd.f32 0.5, %v599_v8  ;;  %1370 = vtanh.f32 %v355_v60  ;;  %v362_v43 = vmul.f32 0.5, %v2317_v2  ;;  %v363_v13 = vmul.f32 0.5, %v2320_v36  ;;  %v2355_v8 = vld [vmem:[%s1672_s30 + $0x328] sm:$0xff] }
  0xa9   : > { %v1353_v48 = vpop.eup %1352  ;;  %982 = vst [vmem:[%s1936_s17 + $0x260] sm:$0xff] %v854_v59  ;;  %v728_v29 = vadd.f32 0.5, %v600_v16  ;;  %v601_v49 = vmul.f32 0.5, %v1351_v28  ;;  %1372 = vtanh.f32 %v356_v63  ;;  %v364_v33 = vmul.f32 0.5, %v2325_v27 }
  0xaa   : > { %v1355_v54 = vpop.eup %1354  ;;  %v855_v51 = vmul.f32 %v727_v5, %v2219_v35  ;;  %v602_v21 = vmul.f32 0.5, %v1353_v48  ;;  %1374 = vtanh.f32 %v357_v24  ;;  %v365_v34 = vmul.f32 0.5, %v2330_v31 }
  0xab   : > { %v1357_v19 = vpop.eup %1356  ;;  %v856_v20 = vmul.f32 %v728_v29, %v2224_v61  ;;  %v729_v18 = vadd.f32 0.5, %v601_v49  ;;  %v603_v42 = vmul.f32 0.5, %v1355_v54  ;;  %1376 = vtanh.f32 %v358_v23 }
  0xac   : > { %v1359_v62 = vpop.eup %1358  ;;  %983 = vst [vmem:[%s1936_s17 + $0x268] sm:$0xff] %v855_v51  ;;  %v730_v53 = vadd.f32 0.5, %v602_v21  ;;  %v604_v9 = vmul.f32 0.5, %v1357_v19  ;;  %1378 = vtanh.f32 %v359_v4  ;;  %v366_v10 = vmul.f32 0.5, %v2338_v0 }
  0xad   : > { %v1361_v35 = vpop.eup %1360  ;;  %984 = vst [vmem:[%s1936_s17 + $0x270] sm:$0xff] %v856_v20  ;;  %v857_v25 = vmul.f32 %v729_v18, %v2232_v17  ;;  %v731_v57 = vadd.f32 0.5, %v603_v42  ;;  %v605_v55 = vmul.f32 0.5, %v1359_v62  ;;  %1380 = vtanh.f32 %v360_v15  ;;  %v2376_v42 = vld [vmem:[%s1672_s30 + $0x340] sm:$0xff] }
  0xae   : > { %v1363_v61 = vpop.eup %1362  ;;  %v858_v22 = vmul.f32 %v730_v53, %v2238_v41  ;;  %v732_v56 = vadd.f32 0.5, %v604_v9  ;;  %v606_v60 = vmul.f32 0.5, %v1361_v35  ;;  %1382 = vtanh.f32 %v361_v12  ;;  %v2360_v12 = vld [vmem:[%s1672_s30 + $0x330] sm:$0xff] }
  0xaf   : > { %v1365_v40 = vpop.eup %1364  ;;  %985 = vst [vmem:[%s1936_s17 + $0x278] sm:$0xff] %v857_v25  ;;  %v859_v63 = vmul.f32 %v731_v57, %v2241_v58  ;;  %v733_v24 = vadd.f32 0.5, %v605_v55  ;;  %v607_v3 = vmul.f32 0.5, %v1363_v61  ;;  %1384 = vtanh.f32 %v362_v43 }
  0xb0   : > { %v1367_v17 = vpop.eup %1366  ;;  %986 = vst [vmem:[%s1936_s17 + $0x280] sm:$0xff] %v858_v22  ;;  %v860_v50 = vmul.f32 %v732_v56, %v2246_v38  ;;  %v734_v23 = vadd.f32 0.5, %v606_v60  ;;  %v608_v41 = vmul.f32 0.5, %v1365_v40  ;;  %1386 = vtanh.f32 %v363_v13  ;;  %v2387_v60 = vld [vmem:[%s1672_s30 + $0x348] sm:$0xff] }
  0xb1   : > { %v1369_v4 = vpop.eup %1368  ;;  %987 = vst [vmem:[%s1936_s17 + $0x288] sm:$0xff] %v859_v63  ;;  %v861_v32 = vmul.f32 %v733_v24, %v2252_v45  ;;  %v735_v11 = vadd.f32 0.5, %v607_v3  ;;  %v609_v58 = vmul.f32 0.5, %v1367_v17  ;;  %1388 = vtanh.f32 %v364_v33  ;;  %v2392_v3 = vld [vmem:[%s1672_s30 + $0x350] sm:$0xff] }
  0xb2   : > { %v1371_v15 = vpop.eup %1370  ;;  %988 = vst [vmem:[%s1936_s17 + $0x290] sm:$0xff] %v860_v50  ;;  %v862_v59 = vmul.f32 %v734_v23, %v2259_v7  ;;  %v736_v38 = vadd.f32 0.5, %v608_v41  ;;  %v610_v16 = vmul.f32 0.5, %v1369_v4  ;;  %1390 = vtanh.f32 %v365_v34  ;;  %v2371_v34 = vld [vmem:[%s1672_s30 + $0x338] sm:$0xff] }
  0xb3   : > { %v1373_v28 = vpop.eup %1372  ;;  %989 = vst [vmem:[%s1936_s17 + $0x298] sm:$0xff] %v861_v32  ;;  %v863_v45 = vmul.f32 %v735_v11, %v2262_v46  ;;  %v737_v5 = vadd.f32 0.5, %v609_v58  ;;  %v611_v43 = vmul.f32 0.5, %v1371_v15  ;;  %1392 = vtanh.f32 %v366_v10  ;;  %v2400_v58 = vld [vmem:[%s1672_s30 + $0x358] sm:$0xff] }
  0xb4   : > { %v1375_v13 = vpop.eup %1374  ;;  %990 = vst [vmem:[%s1936_s17 + $0x2a0] sm:$0xff] %v862_v59  ;;  %v864_v48 = vmul.f32 %v736_v38, %v2268_v47  ;;  %v738_v7 = vadd.f32 0.5, %v610_v16  ;;  %v612_v29 = vmul.f32 0.5, %v1373_v28  ;;  %v367_v49 = vmul.f32 0.5, %v2355_v8  ;;  %v2406_v28 = vld [vmem:[%s1672_s30 + $0x360] sm:$0xff] }
  0xb5   : > { %v1377_v33 = vpop.eup %1376  ;;  %991 = vst [vmem:[%s1936_s17 + $0x2a8] sm:$0xff] %v863_v45  ;;  %v865_v54 = vmul.f32 %v737_v5, %v2271_v1  ;;  %v739_v46 = vadd.f32 0.5, %v611_v43  ;;  %v613_v51 = vmul.f32 0.5, %v1375_v13  ;;  %v368_v21 = vmul.f32 0.5, %v2360_v12  ;;  %v2414_v13 = vld [vmem:[%s1672_s30 + $0x370] sm:$0xff] }
  0xb6   : > { %v1379_v19 = vpop.eup %1378  ;;  %992 = vst [vmem:[%s1936_s17 + $0x2b0] sm:$0xff] %v864_v48  ;;  %v866_v47 = vmul.f32 %v738_v7, %v2277_v37  ;;  %v740_v20 = vadd.f32 0.5, %v612_v29  ;;  %v614_v18 = vmul.f32 0.5, %v1377_v33  ;;  %1394 = vtanh.f32 %v367_v49  ;;  %v2420_v29 = vld [vmem:[%s1672_s30 + $0x378] sm:$0xff] }
  0xb7   : > { %v1381_v62 = vpop.eup %1380  ;;  %993 = vst [vmem:[%s1936_s17 + $0x2b8] sm:$0xff] %v865_v54  ;;  %v867_v1 = vmul.f32 %v739_v46, %v2283_v14  ;;  %v741_v53 = vadd.f32 0.5, %v613_v51  ;;  %v615_v9 = vmul.f32 0.5, %v1379_v19  ;;  %1396 = vtanh.f32 %v368_v21  ;;  %v2430_v51 = vld [vmem:[%s1672_s30 + $0x388] sm:$0xff] }
  0xb8   : > { %v1383_v10 = vpop.eup %1382  ;;  %994 = vst [vmem:[%s1936_s17 + $0x2c0] sm:$0xff] %v866_v47  ;;  %v868_v35 = vmul.f32 %v740_v20, %v2289_v52  ;;  %v742_v37 = vadd.f32 0.5, %v614_v18  ;;  %v616_v25 = vmul.f32 0.5, %v1381_v62  ;;  %v369_v57 = vmul.f32 0.5, %v2371_v34  ;;  %v2436_v20 = vld [vmem:[%s1672_s30 + $0x390] sm:$0xff] }
  0xb9   : > { %v1385_v55 = vpop.eup %1384  ;;  %995 = vst [vmem:[%s1936_s17 + $0x2c8] sm:$0xff] %v867_v1  ;;  %v869_v61 = vmul.f32 %v741_v53, %v2292_v44  ;;  %v743_v14 = vadd.f32 0.5, %v615_v9  ;;  %v617_v22 = vmul.f32 0.5, %v1383_v10  ;;  %v370_v56 = vmul.f32 0.5, %v2376_v42  ;;  %v2442_v53 = vld [vmem:[%s1672_s30 + $0x398] sm:$0xff] }
  0xba   : > { %v1387_v40 = vpop.eup %1386  ;;  %996 = vst [vmem:[%s1936_s17 + $0x2d0] sm:$0xff] %v868_v35  ;;  %v870_v52 = vmul.f32 %v742_v37, %v2297_v26  ;;  %v744_v63 = vadd.f32 0.5, %v616_v25  ;;  %v618_v24 = vmul.f32 0.5, %v1385_v55  ;;  %1398 = vtanh.f32 %v369_v57  ;;  %v2448_v35 = vld [vmem:[%s1672_s30 + $0x3a0] sm:$0xff]  ;;  %v2453_v57 = vld [vmem:[%s1672_s30 + $0x3a8] sm:$0xff]  ;;  %v2456_v55 = vld [vmem:[%s1672_s30 + $0x3b0] sm:$0xff] }
  0xbb   : > { %v1389_v17 = vpop.eup %1388  ;;  %997 = vst [vmem:[%s1936_s17 + $0x2d8] sm:$0xff] %v869_v61  ;;  %v871_v44 = vmul.f32 %v743_v14, %v2300_v6  ;;  %v745_v50 = vadd.f32 0.5, %v617_v22  ;;  %v619_v23 = vmul.f32 0.5, %v1387_v40  ;;  %1400 = vtanh.f32 %v370_v56  ;;  %v2461_v40 = vld [vmem:[%s1672_s30 + $0x3b8] sm:$0xff] }
  0xbc   : > { %v1391_v41 = vpop.eup %1390  ;;  %998 = vst [vmem:[%s1936_s17 + $0x2e0] sm:$0xff] %v870_v52  ;;  %v872_v26 = vmul.f32 %v744_v63, %v2305_v30  ;;  %v746_v4 = vadd.f32 0.5, %v618_v24  ;;  %v620_v32 = vmul.f32 0.5, %v1389_v17  ;;  %v371_v11 = vmul.f32 0.5, %v2387_v60  ;;  %v2409_v30 = vld [vmem:[%s1672_s30 + $0x368] sm:$0xff]  ;;  %v2464_v52 = vld [vmem:[%s1672_s30 + $0x3c0] sm:$0xff] }
  0xbd   : > { %v1393_v15 = vpop.eup %1392  ;;  %999 = vst [vmem:[%s1936_s17 + $0x2e8] sm:$0xff] %v871_v44  ;;  %v873_v6 = vmul.f32 %v745_v50, %v2311_v39  ;;  %v747_v59 = vadd.f32 0.5, %v619_v23  ;;  %v621_v38 = vmul.f32 0.5, %v1391_v41  ;;  %v372_v16 = vmul.f32 0.5, %v2392_v3  ;;  %v2469_v44 = vld [vmem:[%s1672_s30 + $0x3c8] sm:$0xff]  ;;  %v2475_v41 = vld [vmem:[%s1672_s30 + $0x3d0] sm:$0xff] }
  0xbe   : > { %1000 = vst [vmem:[%s1936_s17 + $0x2f0] sm:$0xff] %v872_v26  ;;  %v874_v45 = vmul.f32 %v746_v4, %v2317_v2  ;;  %v748_v5 = vadd.f32 0.5, %v620_v32  ;;  %v622_v43 = vmul.f32 0.5, %v1393_v15  ;;  %1402 = vtanh.f32 %v371_v11  ;;  %v2481_v11 = vld [vmem:[%s1672_s30 + $0x3d8] sm:$0xff]  ;;  %v2484_v15 = vld [vmem:[%s1672_s30 + $0x3e0] sm:$0xff] }
  0xbf   : > { %1001 = vst [vmem:[%s1936_s17 + $0x2f8] sm:$0xff] %v873_v6  ;;  %v875_v39 = vmul.f32 %v747_v59, %v2320_v36  ;;  %v749_v48 = vadd.f32 0.5, %v621_v38  ;;  %1404 = vtanh.f32 %v372_v16  ;;  %v373_v7 = vmul.f32 0.5, %v2400_v58  ;;  %v2427_v36 = vld [vmem:[%s1672_s30 + $0x380] sm:$0xff] }
  0xc0   : > { %v1395_v2 = vpop.eup %1394  ;;  %1002 = vst [vmem:[%s1936_s17 + $0x300] sm:$0xff] %v874_v45  ;;  %v876_v49 = vmul.f32 %v748_v5, %v2325_v27  ;;  %v750_v33 = vadd.f32 0.5, %v622_v43  ;;  %v374_v54 = vmul.f32 0.5, %v2406_v28  ;;  %v375_v46 = vmul.f32 0.5, %v2409_v30  ;;  %v2489_v45 = vld [vmem:[%s1672_s30 + $0x3e8] sm:$0xff] }
  0xc1   : > { %v1397_v21 = vpop.eup %1396  ;;  %1003 = vst [vmem:[%s1936_s17 + $0x308] sm:$0xff] %v875_v39  ;;  %v877_v19 = vmul.f32 %v749_v48, %v2330_v31  ;;  %v623_v47 = vmul.f32 0.5, %v1395_v2  ;;  %1406 = vtanh.f32 %v373_v7  ;;  %v376_v27 = vmul.f32 0.5, %v2414_v13  ;;  %v2494_v48 = vld [vmem:[%s1672_s30 + $0x3f0] sm:$0xff] }
  0xc2   : > { %1004 = vst [vmem:[%s1936_s17 + $0x310] sm:$0xff] %v876_v49  ;;  %v878_v18 = vmul.f32 %v750_v33, %v2338_v0  ;;  %v624_v62 = vmul.f32 0.5, %v1397_v21  ;;  %1408 = vtanh.f32 %v374_v54  ;;  %v377_v1 = vmul.f32 0.5, %v2420_v29  ;;  %v2502_v21 = vld [vmem:[%s1672_s30 + $0x3f8] sm:$0xff] }
  0xc3   : > { %1005 = vst [vmem:[%s1936_s17 + $0x318] sm:$0xff] %v877_v19  ;;  %v751_v31 = vadd.f32 0.5, %v623_v47  ;;  %1410 = vtanh.f32 %v375_v46  ;;  %v378_v9 = vmul.f32 0.5, %v2427_v36  ;;  %v379_v10 = vmul.f32 0.5, %v2430_v51 }
  0xc4   : > { %v1399_v0 = vpop.eup %1398  ;;  %1006 = vst [vmem:[%s1936_s17 + $0x320] sm:$0xff] %v878_v18  ;;  %v752_v37 = vadd.f32 0.5, %v624_v62  ;;  %1412 = vtanh.f32 %v376_v27  ;;  %v380_v25 = vmul.f32 0.5, %v2436_v20  ;;  %v381_v56 = vmul.f32 0.5, %v2442_v53 }
  0xc5   : > { %v1401_v61 = vpop.eup %1400  ;;  %v879_v14 = vmul.f32 %v751_v31, %v2355_v8  ;;  %v625_v22 = vmul.f32 0.5, %v1399_v0  ;;  %1414 = vtanh.f32 %v377_v1  ;;  %v382_v17 = vmul.f32 0.5, %v2448_v35 }
  0xc6   : > { %v880_v63 = vmul.f32 %v752_v37, %v2360_v12  ;;  %v626_v24 = vmul.f32 0.5, %v1401_v61  ;;  %1416 = vtanh.f32 %v378_v9  ;;  %v383_v50 = vmul.f32 0.5, %v2453_v57 }
  0xc7   : > { %1007 = vst [vmem:[%s1936_s17 + $0x328] sm:$0xff] %v879_v14  ;;  %v753_v8 = vadd.f32 0.5, %v625_v22  ;;  %1418 = vtanh.f32 %v379_v10  ;;  %v384_v23 = vmul.f32 0.5, %v2456_v55  ;;  %v385_v4 = vmul.f32 0.5, %v2461_v40 }
  0xc8   : > { %v1403_v26 = vpop.eup %1402  ;;  %1008 = vst [vmem:[%s1936_s17 + $0x330] sm:$0xff] %v880_v63  ;;  %v754_v12 = vadd.f32 0.5, %v626_v24  ;;  %1420 = vtanh.f32 %v380_v25  ;;  %v386_v32 = vmul.f32 0.5, %v2464_v52  ;;  %v387_v16 = vmul.f32 0.5, %v2469_v44 }
  0xc9   : > { %v1405_v6 = vpop.eup %1404  ;;  %v881_v59 = vmul.f32 %v753_v8, %v2371_v34  ;;  %v627_v38 = vmul.f32 0.5, %v1403_v26  ;;  %1422 = vtanh.f32 %v381_v56  ;;  %v388_v39 = vmul.f32 0.5, %v2475_v41 }
  0xca   : > { %v882_v5 = vmul.f32 %v754_v12, %v2376_v42  ;;  %v628_v43 = vmul.f32 0.5, %v1405_v6  ;;  %1424 = vtanh.f32 %v382_v17  ;;  %v389_v34 = vmul.f32 0.5, %v2481_v11 }
  0xcb   : > { %v1407_v7 = vpop.eup %1406  ;;  %1009 = vst [vmem:[%s1936_s17 + $0x338] sm:$0xff] %v881_v59  ;;  %v755_v2 = vadd.f32 0.5, %v627_v38  ;;  %1426 = vtanh.f32 %v383_v50  ;;  %v390_v49 = vmul.f32 0.5, %v2484_v15  ;;  %v391_v46 = vmul.f32 0.5, %v2489_v45 }
  0xcc   : > { %v1409_v33 = vpop.eup %1408  ;;  %1010 = vst [vmem:[%s1936_s17 + $0x340] sm:$0xff] %v882_v5  ;;  %v756_v54 = vadd.f32 0.5, %v628_v43  ;;  %v629_v42 = vmul.f32 0.5, %v1407_v7  ;;  %1428 = vtanh.f32 %v384_v23  ;;  %v392_v18 = vmul.f32 0.5, %v2494_v48 }
  0xcd   : > { %v1411_v19 = vpop.eup %1410  ;;  %v883_v47 = vmul.f32 %v755_v2, %v2387_v60  ;;  %v630_v27 = vmul.f32 0.5, %v1409_v33  ;;  %1430 = vtanh.f32 %v385_v4  ;;  %v393_v25 = vmul.f32 0.5, %v2502_v21 }
  0xce   : > { %v1413_v62 = vpop.eup %1412  ;;  %v884_v1 = vmul.f32 %v756_v54, %v2392_v3  ;;  %v757_v31 = vadd.f32 0.5, %v629_v42  ;;  %v631_v9 = vmul.f32 0.5, %v1411_v19  ;;  %1432 = vtanh.f32 %v386_v32 }
  0xcf   : > { %v1415_v10 = vpop.eup %1414  ;;  %1011 = vst [vmem:[%s1936_s17 + $0x348] sm:$0xff] %v883_v47  ;;  %v758_v0 = vadd.f32 0.5, %v630_v27  ;;  %v632_v37 = vmul.f32 0.5, %v1413_v62  ;;  %1434 = vtanh.f32 %v387_v16 }
  0xd0   : > { %v1417_v60 = vpop.eup %1416  ;;  %1012 = vst [vmem:[%s1936_s17 + $0x350] sm:$0xff] %v884_v1  ;;  %v885_v61 = vmul.f32 %v757_v31, %v2400_v58  ;;  %v759_v14 = vadd.f32 0.5, %v631_v9  ;;  %v633_v22 = vmul.f32 0.5, %v1415_v10  ;;  %1436 = vtanh.f32 %v388_v39 }
  0xd1   : > { %v1419_v3 = vpop.eup %1418  ;;  %v886_v56 = vmul.f32 %v758_v0, %v2406_v28  ;;  %v760_v63 = vadd.f32 0.5, %v632_v37  ;;  %v634_v24 = vmul.f32 0.5, %v1417_v60  ;;  %1438 = vtanh.f32 %v389_v34 }
  0xd2   : > { %v1421_v17 = vpop.eup %1420  ;;  %1013 = vst [vmem:[%s1936_s17 + $0x358] sm:$0xff] %v885_v61  ;;  %v887_v8 = vmul.f32 %v759_v14, %v2409_v30  ;;  %v761_v50 = vadd.f32 0.5, %v633_v22  ;;  %v635_v23 = vmul.f32 0.5, %v1419_v3  ;;  %1440 = vtanh.f32 %v390_v49 }
  0xd3   : > { %v1423_v58 = vpop.eup %1422  ;;  %1014 = vst [vmem:[%s1936_s17 + $0x360] sm:$0xff] %v886_v56  ;;  %v888_v26 = vmul.f32 %v760_v63, %v2414_v13  ;;  %v762_v12 = vadd.f32 0.5, %v634_v24  ;;  %v636_v4 = vmul.f32 0.5, %v1421_v17  ;;  %1442 = vtanh.f32 %v391_v46 }
  0xd4   : > { %v1425_v28 = vpop.eup %1424  ;;  %1015 = vst [vmem:[%s1936_s17 + $0x368] sm:$0xff] %v887_v8  ;;  %v889_v32 = vmul.f32 %v761_v50, %v2420_v29  ;;  %v763_v6 = vadd.f32 0.5, %v635_v23  ;;  %v637_v59 = vmul.f32 0.5, %v1423_v58  ;;  %1444 = vtanh.f32 %v392_v18 }
  0xd5   : > { %v1427_v30 = vpop.eup %1426  ;;  %1016 = vst [vmem:[%s1936_s17 + $0x370] sm:$0xff] %v888_v26  ;;  %v890_v38 = vmul.f32 %v762_v12, %v2427_v36  ;;  %v764_v16 = vadd.f32 0.5, %v636_v4  ;;  %v638_v5 = vmul.f32 0.5, %v1425_v28  ;;  %1446 = vtanh.f32 %v393_v25 }
  0xd6   : > { %v1429_v13 = vpop.eup %1428  ;;  %1017 = vst [vmem:[%s1936_s17 + $0x378] sm:$0xff] %v889_v32  ;;  %v891_v43 = vmul.f32 %v763_v6, %v2430_v51  ;;  %v765_v39 = vadd.f32 0.5, %v637_v59  ;;  %v639_v7 = vmul.f32 0.5, %v1427_v30 }
  0xd7   : > { %v1431_v29 = vpop.eup %1430  ;;  %1018 = vst [vmem:[%s1936_s17 + $0x380] sm:$0xff] %v890_v38  ;;  %v892_v2 = vmul.f32 %v764_v16, %v2436_v20  ;;  %v766_v34 = vadd.f32 0.5, %v638_v5  ;;  %v640_v49 = vmul.f32 0.5, %v1429_v13 }
  0xd8   : > { %v1433_v33 = vpop.eup %1432  ;;  %1019 = vst [vmem:[%s1936_s17 + $0x388] sm:$0xff] %v891_v43  ;;  %v893_v36 = vmul.f32 %v765_v39, %v2442_v53  ;;  %v767_v54 = vadd.f32 0.5, %v639_v7  ;;  %v641_v42 = vmul.f32 0.5, %v1431_v29 }
  0xd9   : > { %v1435_v46 = vpop.eup %1434  ;;  %1020 = vst [vmem:[%s1936_s17 + $0x390] sm:$0xff] %v892_v2  ;;  %v894_v51 = vmul.f32 %v766_v34, %v2448_v35  ;;  %v768_v19 = vadd.f32 0.5, %v640_v49  ;;  %v642_v47 = vmul.f32 0.5, %v1433_v33 }
  0xda   : > { %v1437_v27 = vpop.eup %1436  ;;  %1021 = vst [vmem:[%s1936_s17 + $0x398] sm:$0xff] %v893_v36  ;;  %v895_v20 = vmul.f32 %v767_v54, %v2453_v57  ;;  %v769_v18 = vadd.f32 0.5, %v641_v42  ;;  %v643_v62 = vmul.f32 0.5, %v1435_v46 }
  0xdb   : > { %v1439_v1 = vpop.eup %1438  ;;  %1022 = vst [vmem:[%s1936_s17 + $0x3a0] sm:$0xff] %v894_v51  ;;  %v896_v53 = vmul.f32 %v768_v19, %v2456_v55  ;;  %v770_v31 = vadd.f32 0.5, %v642_v47  ;;  %v644_v9 = vmul.f32 0.5, %v1437_v27 }
  0xdc   : > { %v1441_v10 = vpop.eup %1440  ;;  %1023 = vst [vmem:[%s1936_s17 + $0x3a8] sm:$0xff] %v895_v20  ;;  %v897_v35 = vmul.f32 %v769_v18, %v2461_v40  ;;  %v771_v0 = vadd.f32 0.5, %v643_v62  ;;  %v645_v37 = vmul.f32 0.5, %v1439_v1 }
  0xdd   : > { %v1443_v25 = vpop.eup %1442  ;;  %1024 = vst [vmem:[%s1936_s17 + $0x3b0] sm:$0xff] %v896_v53  ;;  %v898_v57 = vmul.f32 %v770_v31, %v2464_v52  ;;  %v772_v60 = vadd.f32 0.5, %v644_v9  ;;  %v646_v61 = vmul.f32 0.5, %v1441_v10 }
  0xde   : > { %v1445_v14 = vpop.eup %1444  ;;  %1025 = vst [vmem:[%s1936_s17 + $0x3b8] sm:$0xff] %v897_v35  ;;  %v899_v55 = vmul.f32 %v771_v0, %v2469_v44  ;;  %v773_v22 = vadd.f32 0.5, %v645_v37  ;;  %v647_v3 = vmul.f32 0.5, %v1443_v25 }
  0xdf   : > { %v1447_v40 = vpop.eup %1446  ;;  %1026 = vst [vmem:[%s1936_s17 + $0x3c0] sm:$0xff] %v898_v57  ;;  %v900_v56 = vmul.f32 %v772_v60, %v2475_v41  ;;  %v774_v63 = vadd.f32 0.5, %v646_v61  ;;  %v648_v24 = vmul.f32 0.5, %v1445_v14 }
  0xe0   : > { %1027 = vst [vmem:[%s1936_s17 + $0x3c8] sm:$0xff] %v899_v55  ;;  %v901_v52 = vmul.f32 %v773_v22, %v2481_v11  ;;  %v775_v17 = vadd.f32 0.5, %v647_v3  ;;  %v649_v8 = vmul.f32 0.5, %v1447_v40 }
  0xe1   : > { %1028 = vst [vmem:[%s1936_s17 + $0x3d0] sm:$0xff] %v900_v56  ;;  %v902_v44 = vmul.f32 %v774_v63, %v2484_v15  ;;  %v776_v50 = vadd.f32 0.5, %v648_v24 }
  0xe2   : > { %1029 = vst [vmem:[%s1936_s17 + $0x3d8] sm:$0xff] %v901_v52  ;;  %v903_v41 = vmul.f32 %v775_v17, %v2489_v45  ;;  %v777_v23 = vadd.f32 0.5, %v649_v8 }
  0xe3   : > { %1030 = vst [vmem:[%s1936_s17 + $0x3e0] sm:$0xff] %v902_v44  ;;  %v904_v58 = vmul.f32 %v776_v50, %v2494_v48 }
  0xe4   : > { %1031 = vst [vmem:[%s1936_s17 + $0x3e8] sm:$0xff] %v903_v41  ;;  %v905_v11 = vmul.f32 %v777_v23, %v2502_v21 }
  0xe5   : > { %1032 = vst [vmem:[%s1936_s17 + $0x3f0] sm:$0xff] %v904_v58 }
  0xe6   : > { %1033 = vst [vmem:[%s1936_s17 + $0x3f8] sm:$0xff] %v905_v11 }
  0xe7   : > { %1491 = shalt.err (!%p1488_p2)
}
  0xe8   : > { %s1492_s13 = scalar_lea.hbm %s2553_s2, 16384  ;;  %s1496_s20 = scalar_lea.hbm %s2604_s1, 32768 }
  0xe9   : > { %p1493_p4 = scmp.ne.s32.totalorder %s2553_s2, %s1492_s13  ;;  %p1497_p9 = scmp.lt.u32.totalorder %s2553_s2, %s2604_s1 }
  0xea   : > { %p1498_p1 = scmp.lt.u32.totalorder %s1496_s20, %s1492_s13  ;;  %p1500_p6 = scmp.lt.u32.totalorder %s1492_s13, %s2553_s2 }
  0xeb   : > { %p1494_p5 = pnand %p1493_p4, %p2686_p11 }
  0xec   : > { %p1499_p3 = por %p1498_p1, %p1497_p9 }
  0xed   : > { %p1495_p7 = pneg %p1494_p5 }
  0xee   : > { %p1501_p12 = por %p1500_p6, %p1499_p3 }
  0xf0   : > { %p1502_p13 = pnand %p1501_p12, %p1495_p7 }
  0xf2   : > { %1505 = shalt.err (!%p1502_p13)
}
  0xf3   : > { %s1550_s24 = smov 1024   ;;  %s1551_s26 = smov 64  }
  0xf4   : > { %1144 = dma.vmem_to_hbm [thread:$0]  (%p2686_p11), %s2555_s27, 16384, %s2553_s2, %s1035_s10, %s1550_s24, %s1550_s24, %s1551_s26  }
  0xf5 PF: > { %s1064_s30 = sand.u32 1, %s1532_s6   ;;  %p2687_p8 = scmp.ne.s32.totalorder %s2630_s19, 0 }
  0xf6   : > { %p2688_p10 = scmp.ge.s32.totalorder %s1544_s9, 2  ;;  %s1065_s17 = scalar_lea.sflag [#allocation4], %s1064_s30 }
  0xf8   : > { %p1151_p0 = pnand %p2688_p10, %p2687_p8 }
  0xfa   : > { %1527 = dma.done.wait (!%p1151_p0), %s1065_s17, 16384  }
  0xfb   : > { %1529 = vsyncadd (!%p1151_p0), %s1065_s17, 4294950912  ;;  %p14_p2 = scmp.ge.s32.totalorder %s1587_s12, 4   ;;  %s2689_s6 = smov %s1536_s7 }
  0xfc   : > { %s2690_s7 = smov %s1540_s8  ;;  %s2691_s8 = smov %s1599_s15 }
  0xfd   : > { %s2692_s9 = smov %s1587_s12  ;;  %16 = sbr.rel (!%p14_p2) target bundleno = 5 (0x5), region = 69 }
 0x104   :  { %1070 = vsyncpa [#allocation3], 1 }
 0x105   :  { %1072 = vsyncpa [#allocation3 + $0x1], 1 }
 0x106   :  { %1073 = vsyncpa [#allocation4], 1 }
 0x107   :  { %1075 = vsyncpa [#allocation4 + $0x1], 1 }

</bundles_post_ra>
